<compile_context>
chip_gen: v6e
topology: v6e:2x2x1
jax: 0.10.0
libtpu: 0.0.40
codegen_flags: <defaults>
</compile_context>

<pallas_src>
import functools

import jax
import jax.numpy as jnp
from jax.experimental import pallas as pl
from jax.experimental.pallas import tpu as pltpu

LANE = 128
BN_EPS = 1e-5
VMEM_BUDGET = 40 * 1024 * 1024          # conservative for v7x (64 MiB physical)
VMEM_LIMIT = 48 * 1024 * 1024


def _rup(x, m=LANE):
    return (x + m - 1) // m * m


def _pad_to(x, axis, size):
    cur = x.shape[axis]
    if cur == size:
        return x
    pads = [(0, 0)] * x.ndim
    pads[axis] = (0, size - cur)
    return jnp.pad(x, pads)


# ---------------------------------------------------------------------------
# Pallas kernels
# ---------------------------------------------------------------------------

def _matmul_bn_single_kernel(*refs, relu, fuse_residual):
    """One K tile: out = [ReLU](A @ W + bias [+ residual]); no scratch needed."""
    if fuse_residual:
        a_ref, w_ref, b_ref, r_ref, o_ref = refs
    else:
        a_ref, w_ref, b_ref, o_ref = refs
    y = jnp.dot(a_ref[...], w_ref[...], preferred_element_type=jnp.float32)
    y = y + b_ref[...]
    if fuse_residual:
        y = y + r_ref[...].astype(jnp.float32)
    if relu:
        y = jnp.maximum(y, 0.0)
    o_ref[...] = y.astype(o_ref.dtype)


def _matmul_bn_multi_kernel(*refs, relu, fuse_residual):
    """K-axis accumulation variant (grid = (M tiles, K tiles))."""
    if fuse_residual:
        a_ref, w_ref, b_ref, r_ref, o_ref, acc_ref = refs
    else:
        a_ref, w_ref, b_ref, o_ref, acc_ref = refs

    k = pl.program_id(1)

    @pl.when(k == 0)
    def _():
        acc_ref[...] = jnp.zeros_like(acc_ref)

    acc_ref[...] += jnp.dot(a_ref[...], w_ref[...],
                            preferred_element_type=jnp.float32)

    @pl.when(k == pl.num_programs(1) - 1)
    def _():
        y = acc_ref[...] + b_ref[...]
        if fuse_residual:
            y = y + r_ref[...].astype(jnp.float32)
        if relu:
            y = jnp.maximum(y, 0.0)
        o_ref[...] = y.astype(o_ref.dtype)


def _dual_matmul_bn_relu_kernel(a1_ref, w1_ref, a2_ref, w2_ref, b_ref, o_ref):
    """out = ReLU(A1 @ W1 + A2 @ W2 + bias)  (conv3 + identity projection fused)."""
    y = jnp.dot(a1_ref[...], w1_ref[...], preferred_element_type=jnp.float32)
    y = y + jnp.dot(a2_ref[...], w2_ref[...], preferred_element_type=jnp.float32)
    y = y + b_ref[...]
    o_ref[...] = jnp.maximum(y, 0.0).astype(o_ref.dtype)


# ---------------------------------------------------------------------------
# Kernel wrappers
# ---------------------------------------------------------------------------

def _pick_tm(M):
    if M >= 2048:
        return 1024
    if M >= 1024:
        return 512
    if M >= 512:
        return 256
    return 128


def matmul_bn(a, w, scale, bias, *, relu, residual=None, out_dtype=jnp.bfloat16):
    """out = [ReLU]( a @ (w * scale) + bias [+ residual] ), f32 accumulation.

    a: (M, K), w: (K, C), scale/bias: (C,). C must be a multiple of 128
    (callers pad channels).  M and K are padded here as needed.
    """
    M, K = a.shape
    Kw, C = w.shape
    assert K == Kw
    assert C % LANE == 0

    # Fold BN scale into the weight columns; bf16 inputs for the MXU.
    wm = (w.astype(jnp.float32) * scale.astype(jnp.float32)[None, :]).astype(jnp.bfloat16)
    b2 = bias.reshape(1, C).astype(jnp.float32)
    a = a.astype(jnp.bfloat16)
    res = None if residual is None else residual.astype(jnp.bfloat16)

    # ---- tile selection ----------------------------------------------------
    tm = _pick_tm(M)
    tk = K if K <= 2048 else 1024
    out_itemsize = jnp.dtype(out_dtype).itemsize

    def vmem_bytes(tm_):
        return (2 * tm_ * tk * 2            # a tile, bf16, double-buffered
                + 2 * tk * C * 2            # w tile, bf16
                + 2 * C * 4                 # bias
                + 2 * tm_ * C * out_itemsize
                + (0 if res is None else 2 * tm_ * C * 2)
                + tm_ * C * 4)              # f32 accumulator scratch

    while tm > 128 and vmem_bytes(tm) > VMEM_BUDGET:
        tm //= 2

    Mp = _rup(M, tm)
    Kp = _rup(K, tk)
    if Mp != M:
        a = jnp.pad(a, ((0, Mp - M), (0, 0)))
        if res is not None:
            res = jnp.pad(res, ((0, Mp - M), (0, 0)))
    if Kp != K:
        a = jnp.pad(a, ((0, 0), (0, Kp - K)))
        wm = jnp.pad(wm, ((0, Kp - K), (0, 0)))

    single_k = (Kp == tk)
    fuse_residual = res is not None

    if single_k:
        grid = (Mp // tm,)
        in_specs = [
            pl.BlockSpec((tm, tk), lambda i: (i, 0)),
            pl.BlockSpec((tk, C), lambda i: (0, 0)),
            pl.BlockSpec((1, C), lambda i: (0, 0)),
        ]
        operands = [a, wm, b2]
        if fuse_residual:
            in_specs.append(pl.BlockSpec((tm, C), lambda i: (i, 0)))
            operands.append(res)
        out = pl.pallas_call(
            functools.partial(_matmul_bn_single_kernel, relu=relu,
                              fuse_residual=fuse_residual),
            out_shape=jax.ShapeDtypeStruct((Mp, C), out_dtype),
            grid=grid,
            in_specs=in_specs,
            out_specs=pl.BlockSpec((tm, C), lambda i: (i, 0)),
            compiler_params=pltpu.CompilerParams(
                dimension_semantics=("parallel",),
                vmem_limit_bytes=VMEM_LIMIT),
        )(*operands)
    else:
        grid = (Mp // tm, Kp // tk)
        in_specs = [
            pl.BlockSpec((tm, tk), lambda i, k: (i, k)),
            pl.BlockSpec((tk, C), lambda i, k: (k, 0)),
            pl.BlockSpec((1, C), lambda i, k: (0, 0)),
        ]
        operands = [a, wm, b2]
        if fuse_residual:
            in_specs.append(pl.BlockSpec((tm, C), lambda i, k: (i, 0)))
            operands.append(res)
        out = pl.pallas_call(
            functools.partial(_matmul_bn_multi_kernel, relu=relu,
                              fuse_residual=fuse_residual),
            out_shape=jax.ShapeDtypeStruct((Mp, C), out_dtype),
            grid=grid,
            in_specs=in_specs,
            out_specs=pl.BlockSpec((tm, C), lambda i, k: (i, 0)),
            scratch_shapes=[pltpu.VMEM((tm, C), jnp.float32)],
            compiler_params=pltpu.CompilerParams(
                dimension_semantics=("parallel", "arbitrary"),
                vmem_limit_bytes=VMEM_LIMIT),
        )(*operands)
    return out if Mp == M else out[:M]


def dual_matmul_bn_relu(a1, w1, scale1, bias1, a2, w2, scale2, bias2,
                        out_dtype=jnp.float32):
    """out = ReLU(a1 @ (w1*scale1) + a2 @ (w2*scale2) + bias1 + bias2).

    Returns None (at trace time) if the fused tiles would not fit the VMEM
    budget; the caller then falls back to the two-kernel path.
    """
    M, K1 = a1.shape
    M2, K2 = a2.shape
    assert M == M2
    C = w1.shape[1]
    assert w2.shape[1] == C and C % LANE == 0
    assert K1 % LANE == 0 and K2 % LANE == 0

    w1m = (w1.astype(jnp.float32) * scale1.astype(jnp.float32)[None, :]).astype(jnp.bfloat16)
    w2m = (w2.astype(jnp.float32) * scale2.astype(jnp.float32)[None, :]).astype(jnp.bfloat16)
    b = (bias1.astype(jnp.float32) + bias2.astype(jnp.float32)).reshape(1, C)
    a1 = a1.astype(jnp.bfloat16)
    a2 = a2.astype(jnp.bfloat16)

    out_itemsize = jnp.dtype(out_dtype).itemsize

    def vmem_bytes(tm_):
        return (2 * tm_ * K1 * 2 + 2 * tm_ * K2 * 2     # activation tiles
                + 2 * K1 * C * 2 + 2 * K2 * C * 2       # weight tiles
                + 2 * C * 4                              # bias
                + 2 * tm_ * C * out_itemsize)            # output tile

    tm = _pick_tm(M)
    while tm > 128 and vmem_bytes(tm) > VMEM_BUDGET:
        tm //= 2
    if vmem_bytes(tm) > VMEM_BUDGET:
        return None

    Mp = _rup(M, tm)
    if Mp != M:
        a1 = jnp.pad(a1, ((0, Mp - M), (0, 0)))
        a2 = jnp.pad(a2, ((0, Mp - M), (0, 0)))

    out = pl.pallas_call(
        _dual_matmul_bn_relu_kernel,
        out_shape=jax.ShapeDtypeStruct((Mp, C), out_dtype),
        grid=(Mp // tm,),
        in_specs=[
            pl.BlockSpec((tm, K1), lambda i: (i, 0)),
            pl.BlockSpec((K1, C), lambda i: (0, 0)),
            pl.BlockSpec((tm, K2), lambda i: (i, 0)),
            pl.BlockSpec((K2, C), lambda i: (0, 0)),
            pl.BlockSpec((1, C), lambda i: (0, 0)),
        ],
        out_specs=pl.BlockSpec((tm, C), lambda i: (i, 0)),
        compiler_params=pltpu.CompilerParams(
            dimension_semantics=("parallel",),
            vmem_limit_bytes=VMEM_LIMIT),
    )(a1, w1m, a2, w2m, b)
    return out if Mp == M else out[:M]


# ---------------------------------------------------------------------------
# Plain-JAX glue: BN folding, patch extraction, block wrappers
# ---------------------------------------------------------------------------

def fold_bn(bn):
    scale = bn["gamma"] / jnp.sqrt(bn["var"] + BN_EPS)
    bias = bn["beta"] - bn["mean"] * scale
    return scale, bias


def conv1x1_block_fwd(x_nhwc, w_oihw, bn, *, stride, relu,
                      residual=None, out_dtype=jnp.bfloat16):
    """1x1 conv + BN (+residual) (+ReLU).  x_nhwc is channel-padded bf16."""
    N, H, W, Cin_p = x_nhwc.shape
    xs = x_nhwc[:, ::stride, ::stride, :]
    Ho, Wo = xs.shape[1], xs.shape[2]
    a = xs.reshape(N * Ho * Wo, Cin_p)

    Cout = w_oihw.shape[0]
    Cout_p = _rup(Cout)
    wm = jnp.transpose(w_oihw[:, :, 0, 0])                 # (Cin, Cout)
    wm = _pad_to(_pad_to(wm, 0, Cin_p), 1, Cout_p)         # (Cin_p, Cout_p)
    scale, bias = fold_bn(bn)
    scale = _pad_to(scale, 0, Cout_p)
    bias = _pad_to(bias, 0, Cout_p)

    res = None if residual is None else residual.reshape(N * Ho * Wo, -1)
    y = matmul_bn(a, wm, scale, bias, relu=relu, residual=res,
                  out_dtype=out_dtype)
    return y.reshape(N, Ho, Wo, Cout_p)


def _im2col_3x3(x_nhwc, stride, padding, dilation):
    # TODO(synk): keep the 3x3 tap expansion inside the kernel (manual DMA over
    # 9 shifted views) instead of materializing the (M, 9*Cin) buffer in HBM.
    N, H, W, C = x_nhwc.shape
    xp = jnp.pad(x_nhwc, ((0, 0), (padding, padding), (padding, padding), (0, 0)))
    Ho = (H + 2 * padding - dilation * 2 - 1) // stride + 1
    Wo = (W + 2 * padding - dilation * 2 - 1) // stride + 1
    cols = []
    for kh in range(3):
        for kw in range(3):
            patch = xp[:,
                       kh * dilation: kh * dilation + stride * Ho: stride,
                       kw * dilation: kw * dilation + stride * Wo: stride, :]
            cols.append(patch)
    # concat ordering along last axis: (kh, kw, cin)
    return jnp.concatenate(cols, axis=-1), Ho, Wo


def conv3x3_block_fwd(x_nhwc, w_oihw, bn, *, stride, padding, dilation, relu,
                      out_dtype=jnp.bfloat16):
    N, H, W, Cin_p = x_nhwc.shape
    patches, Ho, Wo = _im2col_3x3(x_nhwc, stride, padding, dilation)
    a = patches.reshape(N * Ho * Wo, 9 * Cin_p)

    Cout = w_oihw.shape[0]
    Cout_p = _rup(Cout)
    # (Cout, Cin, 3, 3) -> (kh, kw, Cin_p, Cout_p) -> (9*Cin_p, Cout_p)
    wm = jnp.transpose(w_oihw, (2, 3, 1, 0))
    wm = _pad_to(_pad_to(wm, 2, Cin_p), 3, Cout_p)
    wm = wm.reshape(9 * Cin_p, Cout_p)
    scale, bias = fold_bn(bn)
    scale = _pad_to(scale, 0, Cout_p)
    bias = _pad_to(bias, 0, Cout_p)

    y = matmul_bn(a, wm, scale, bias, relu=relu, out_dtype=out_dtype)
    return y.reshape(N, Ho, Wo, Cout_p)


def fused_conv3_identity_fwd(h_nhwc, w3_oihw, bn3, x_nhwc, wid_oihw, bnid, *,
                             stride, out_dtype=jnp.float32):
    """ReLU( conv1x1_BN(h; conv3) + conv1x1_BN(x strided; identity) ) fused."""
    N, Ho, Wo, Kh = h_nhwc.shape
    xs = x_nhwc[:, ::stride, ::stride, :]
    assert xs.shape[1] == Ho and xs.shape[2] == Wo
    Ki = xs.shape[3]
    a1 = h_nhwc.reshape(N * Ho * Wo, Kh)
    a2 = xs.reshape(N * Ho * Wo, Ki)

    Cout = w3_oihw.shape[0]
    Cout_p = _rup(Cout)
    w3m = jnp.transpose(w3_oihw[:, :, 0, 0])
    w3m = _pad_to(_pad_to(w3m, 0, Kh), 1, Cout_p)
    widm = jnp.transpose(wid_oihw[:, :, 0, 0])
    widm = _pad_to(_pad_to(widm, 0, Ki), 1, Cout_p)
    s3, b3 = fold_bn(bn3)
    sid, bid = fold_bn(bnid)
    s3 = _pad_to(s3, 0, Cout_p)
    b3 = _pad_to(b3, 0, Cout_p)
    sid = _pad_to(sid, 0, Cout_p)
    bid = _pad_to(bid, 0, Cout_p)

    y = dual_matmul_bn_relu(a1, w3m, s3, b3, a2, widm, sid, bid,
                            out_dtype=out_dtype)
    if y is None:
        return None
    return y.reshape(N, Ho, Wo, Cout_p)


# ---------------------------------------------------------------------------
# ResUnit (bottleneck=True, conv1_stride=False, use_bn=True, bias=False)
# ---------------------------------------------------------------------------

def init_params(key, in_channels, out_channels, bottleneck_factor=4):
    mid = out_channels // bottleneck_factor
    keys = jax.random.split(key, 16)

    def conv_w(k, cout, cin, kh, kw):
        return 0.1 * jax.random.normal(k, (cout, cin, kh, kw), jnp.float32)

    def bn_p(k, c):
        k1, k2, k3, k4 = jax.random.split(k, 4)
        return {
            "gamma": 1.0 + 0.1 * jax.random.normal(k1, (c,), jnp.float32),
            "beta": 0.05 * jax.random.normal(k2, (c,), jnp.float32),
            "mean": 0.1 * jax.random.normal(k3, (c,), jnp.float32),
            "var": 1.0 + 0.1 * jnp.abs(jax.random.normal(k4, (c,), jnp.float32)),
        }

    return {
        "conv1_w": conv_w(keys[0], mid, in_channels, 1, 1),
        "conv1_bn": bn_p(keys[1], mid),
        "conv2_w": conv_w(keys[2], mid, mid, 3, 3),
        "conv2_bn": bn_p(keys[3], mid),
        "conv3_w": conv_w(keys[4], out_channels, mid, 1, 1),
        "conv3_bn": bn_p(keys[5], out_channels),
        "id_w": conv_w(keys[6], out_channels, in_channels, 1, 1),
        "id_bn": bn_p(keys[7], out_channels),
    }


def res_unit_forward(params, x_nchw, in_channels, out_channels, stride,
                     padding=1, dilation=1):
    resize_identity = (in_channels != out_channels) or (stride != 1)
    x = jnp.transpose(x_nchw, (0, 2, 3, 1))                 # NCHW -> NHWC
    xp = _pad_to(x, 3, _rup(in_channels)).astype(jnp.bfloat16)

    # body (ResBottleneck, conv1_stride=False)
    h = conv1x1_block_fwd(xp, params["conv1_w"], params["conv1_bn"],
                          stride=1, relu=True)
    h = conv3x3_block_fwd(h, params["conv2_w"], params["conv2_bn"],
                          stride=stride, padding=padding, dilation=dilation,
                          relu=True)

    if resize_identity:
        # conv3 + identity-projection + residual add + final ReLU, one kernel.
        out = fused_conv3_identity_fwd(h, params["conv3_w"], params["conv3_bn"],
                                       xp, params["id_w"], params["id_bn"],
                                       stride=stride, out_dtype=jnp.float32)
        if out is None:
            # VMEM fallback: separate identity conv, residual fused into conv3.
            ident = conv1x1_block_fwd(xp, params["id_w"], params["id_bn"],
                                      stride=stride, relu=False)
            out = conv1x1_block_fwd(h, params["conv3_w"], params["conv3_bn"],
                                    stride=1, relu=True, residual=ident,
                                    out_dtype=jnp.float32)
    else:
        # identity is x itself; residual add + final ReLU fused into conv3.
        out = conv1x1_block_fwd(h, params["conv3_w"], params["conv3_bn"],
                                stride=1, relu=True, residual=xp,
                                out_dtype=jnp.float32)

    out = out[..., :out_channels]                            # drop channel pad
    return jnp.transpose(out, (0, 3, 1, 2))                  # NHWC -> NCHW


# ---------------------------------------------------------------------------
# Pure-JAX f32 reference (NCHW, same semantics as the PyTorch module)
# ---------------------------------------------------------------------------

def _conv_ref(x, w, stride, padding, dilation):
    return jax.lax.conv_general_dilated(
        x, w, window_strides=(stride, stride),
        padding=((padding, padding), (padding, padding)),
        rhs_dilation=(dilation, dilation),
        dimension_numbers=("NCHW", "OIHW", "NCHW"))


def _bn_ref(x, bn):
    sh = (1, -1, 1, 1)
    return ((x - bn["mean"].reshape(sh)) / jnp.sqrt(bn["var"].reshape(sh) + BN_EPS)
            * bn["gamma"].reshape(sh) + bn["beta"].reshape(sh))


def res_unit_ref(params, x, stride, padding=1, dilation=1):
    h = jax.nn.relu(_bn_ref(_conv_ref(x, params["conv1_w"], 1, 0, 1), params["conv1_bn"]))
    h = jax.nn.relu(_bn_ref(_conv_ref(h, params["conv2_w"], stride, padding, dilation),
                            params["conv2_bn"]))
    h = _bn_ref(_conv_ref(h, params["conv3_w"], 1, 0, 1), params["conv3_bn"])
    ident = _bn_ref(_conv_ref(x, params["id_w"], stride, 0, 1), params["id_bn"])
    return jax.nn.relu(h + ident)


# ---------------------------------------------------------------------------
# main
# ---------------------------------------------------------------------------

if __name__ == "__main__":
    in_channels, out_channels, stride = 16, 32, 2
    N, H, W = 2, 16, 16

    key = jax.random.PRNGKey(0)
    k_param, k_x = jax.random.split(key)
    params = init_params(k_param, in_channels, out_channels)
    x = jax.random.normal(k_x, (N, in_channels, H, W), jnp.float32)

    fwd = jax.jit(functools.partial(res_unit_forward,
                                    in_channels=in_channels,
                                    out_channels=out_channels,
                                    stride=stride))
    out = jax.block_until_ready(fwd(params, x))

    ref = jax.block_until_ready(res_unit_ref(params, x, stride))
    assert out.shape == ref.shape == (N, out_channels, H // stride, W // stride)
    # bf16 MXU inputs + bf16 intermediates -> loosened tolerance vs f32 reference
    max_err = float(jnp.max(jnp.abs(out - ref)))
    assert jnp.allclose(out, ref, rtol=5e-2, atol=5e-2), f"max abs err {max_err}"

    print("KERNEL_OK")
</pallas_src>

<mosaic_0001>
module attributes {stable_mosaic.version = 11 : i64} {
  func.func @_matmul_bn_single_kernel(%arg0: i32, %arg1: memref<256x128xbf16, #tpu.memory_space<vmem>>, %arg2: memref<128x128xbf16, #tpu.memory_space<vmem>>, %arg3: memref<1x128xf32, #tpu.memory_space<vmem>>, %arg4: memref<256x128xbf16, #tpu.memory_space<vmem>>) attributes {dimension_semantics = [#tpu.dimension_semantics<parallel>], iteration_bounds = array<i64: 2>, scalar_prefetch = 0 : i64, scratch_operands = 0 : i64, tpu.core_type = #tpu.core_type<tc>, window_params = [{transform_indices = @transform_0, window_bounds = array<i64: 256, 128>}, {pipeline_mode = #tpu.pipeline_mode<synchronous>, transform_indices = @transform_1, window_bounds = array<i64: 128, 128>}, {pipeline_mode = #tpu.pipeline_mode<synchronous>, transform_indices = @transform_2, window_bounds = array<i64: 1, 128>}, {transform_indices = @transform_3, window_bounds = array<i64: 256, 128>}]} {
    %c0 = arith.constant 0 : index
    %c0_0 = arith.constant 0 : index
    %0 = vector.load %arg1[%c0, %c0_0] : memref<256x128xbf16, #tpu.memory_space<vmem>>, vector<256x128xbf16>
    %c0_1 = arith.constant 0 : index
    %c0_2 = arith.constant 0 : index
    %1 = vector.load %arg2[%c0_1, %c0_2] : memref<128x128xbf16, #tpu.memory_space<vmem>>, vector<128x128xbf16>
    %cst = arith.constant dense<0.000000e+00> : vector<256x128xf32>
    %2 = tpu.matmul %0, %1, %cst {dimension_numbers = #tpu.dot_dimension_numbers<[1], [0], [0], [1], [0, 0, 1, 1], [], []>} : vector<256x128xbf16>, vector<128x128xbf16>, vector<256x128xf32> -> vector<256x128xf32>
    %c0_3 = arith.constant 0 : index
    %c0_4 = arith.constant 0 : index
    %3 = vector.load %arg3[%c0_3, %c0_4] : memref<1x128xf32, #tpu.memory_space<vmem>>, vector<1x128xf32>
    %4 = vector.broadcast %3 : vector<1x128xf32> to vector<256x128xf32>
    %5 = arith.addf %2, %4 : vector<256x128xf32>
    %cst_5 = arith.constant 0.000000e+00 : f32
    %6 = vector.broadcast %cst_5 : f32 to vector<256x128xf32>
    %7 = arith.maximumf %5, %6 : vector<256x128xf32>
    %8 = arith.truncf %7 : vector<256x128xf32> to vector<256x128xbf16>
    %c0_6 = arith.constant 0 : index
    %c0_7 = arith.constant 0 : index
    %9 = vector.load %arg4[%c0_6, %c0_7] : memref<256x128xbf16, #tpu.memory_space<vmem>>, vector<256x128xbf16>
    tpu.vector_store %arg4[%c0_6, %c0_7], %8 {strides = array<i32>} : memref<256x128xbf16, #tpu.memory_space<vmem>>, vector<256x128xbf16>,
    return
  }
  func.func @transform_0(%arg0: i32) -> (i32, i32) {
    %c0_i32 = arith.constant 0 : i32
    %c0_i32_0 = arith.constant 0 : i32
    return %arg0, %c0_i32 : i32, i32
  }
  func.func @transform_1(%arg0: i32) -> (i32, i32) {
    %c0_i32 = arith.constant 0 : i32
    %c0_i32_0 = arith.constant 0 : i32
    %c0_i32_1 = arith.constant 0 : i32
    return %c0_i32, %c0_i32_0 : i32, i32
  }
  func.func @transform_2(%arg0: i32) -> (i32, i32) {
    %c0_i32 = arith.constant 0 : i32
    %c0_i32_0 = arith.constant 0 : i32
    %c0_i32_1 = arith.constant 0 : i32
    return %c0_i32, %c0_i32_0 : i32, i32
  }
  func.func @transform_3(%arg0: i32) -> (i32, i32) {
    %c0_i32 = arith.constant 0 : i32
    %c0_i32_0 = arith.constant 0 : i32
    return %arg0, %c0_i32 : i32, i32
  }
}

module attributes {stable_mosaic.version = 11 : i64} {
  func.func @_dual_matmul_bn_relu_kernel(%arg0: i32, %arg1: memref<128x128xbf16, #tpu.memory_space<vmem>>, %arg2: memref<128x128xbf16, #tpu.memory_space<vmem>>, %arg3: memref<128x128xbf16, #tpu.memory_space<vmem>>, %arg4: memref<128x128xbf16, #tpu.memory_space<vmem>>, %arg5: memref<1x128xf32, #tpu.memory_space<vmem>>, %arg6: memref<128x128xf32, #tpu.memory_space<vmem>>) attributes {dimension_semantics = [#tpu.dimension_semantics<parallel>], iteration_bounds = array<i64: 1>, scalar_prefetch = 0 : i64, scratch_operands = 0 : i64, tpu.core_type = #tpu.core_type<tc>, window_params = [{transform_indices = @transform_0, window_bounds = array<i64: 128, 128>}, {pipeline_mode = #tpu.pipeline_mode<synchronous>, transform_indices = @transform_1, window_bounds = array<i64: 128, 128>}, {transform_indices = @transform_2, window_bounds = array<i64: 128, 128>}, {pipeline_mode = #tpu.pipeline_mode<synchronous>, transform_indices = @transform_3, window_bounds = array<i64: 128, 128>}, {pipeline_mode = #tpu.pipeline_mode<synchronous>, transform_indices = @transform_4, window_bounds = array<i64: 1, 128>}, {transform_indices = @transform_5, window_bounds = array<i64: 128, 128>}]} {
    %c0 = arith.constant 0 : index
    %c0_0 = arith.constant 0 : index
    %0 = vector.load %arg1[%c0, %c0_0] : memref<128x128xbf16, #tpu.memory_space<vmem>>, vector<128x128xbf16>
    %c0_1 = arith.constant 0 : index
    %c0_2 = arith.constant 0 : index
    %1 = vector.load %arg2[%c0_1, %c0_2] : memref<128x128xbf16, #tpu.memory_space<vmem>>, vector<128x128xbf16>
    %cst = arith.constant dense<0.000000e+00> : vector<128x128xf32>
    %2 = tpu.matmul %0, %1, %cst {dimension_numbers = #tpu.dot_dimension_numbers<[1], [0], [0], [1], [0, 0, 1, 1], [], []>} : vector<128x128xbf16>, vector<128x128xbf16>, vector<128x128xf32> -> vector<128x128xf32>
    %c0_3 = arith.constant 0 : index
    %c0_4 = arith.constant 0 : index
    %3 = vector.load %arg3[%c0_3, %c0_4] : memref<128x128xbf16, #tpu.memory_space<vmem>>, vector<128x128xbf16>
    %c0_5 = arith.constant 0 : index
    %c0_6 = arith.constant 0 : index
    %4 = vector.load %arg4[%c0_5, %c0_6] : memref<128x128xbf16, #tpu.memory_space<vmem>>, vector<128x128xbf16>
    %cst_7 = arith.constant dense<0.000000e+00> : vector<128x128xf32>
    %5 = tpu.matmul %3, %4, %cst_7 {dimension_numbers = #tpu.dot_dimension_numbers<[1], [0], [0], [1], [0, 0, 1, 1], [], []>} : vector<128x128xbf16>, vector<128x128xbf16>, vector<128x128xf32> -> vector<128x128xf32>
    %6 = arith.addf %2, %5 : vector<128x128xf32>
    %c0_8 = arith.constant 0 : index
    %c0_9 = arith.constant 0 : index
    %7 = vector.load %arg5[%c0_8, %c0_9] : memref<1x128xf32, #tpu.memory_space<vmem>>, vector<1x128xf32>
    %8 = vector.broadcast %7 : vector<1x128xf32> to vector<128x128xf32>
    %9 = arith.addf %6, %8 : vector<128x128xf32>
    %cst_10 = arith.constant 0.000000e+00 : f32
    %10 = vector.broadcast %cst_10 : f32 to vector<128x128xf32>
    %11 = arith.maximumf %9, %10 : vector<128x128xf32>
    %c0_11 = arith.constant 0 : index
    %c0_12 = arith.constant 0 : index
    %12 = vector.load %arg6[%c0_11, %c0_12] : memref<128x128xf32, #tpu.memory_space<vmem>>, vector<128x128xf32>
    tpu.vector_store %arg6[%c0_11, %c0_12], %11 {strides = array<i32>} : memref<128x128xf32, #tpu.memory_space<vmem>>, vector<128x128xf32>,
    return
  }
  func.func @transform_0(%arg0: i32) -> (i32, i32) {
    %c0_i32 = arith.constant 0 : i32
    %c0_i32_0 = arith.constant 0 : i32
    return %arg0, %c0_i32 : i32, i32
  }
  func.func @transform_1(%arg0: i32) -> (i32, i32) {
    %c0_i32 = arith.constant 0 : i32
    %c0_i32_0 = arith.constant 0 : i32
    %c0_i32_1 = arith.constant 0 : i32
    return %c0_i32, %c0_i32_0 : i32, i32
  }
  func.func @transform_2(%arg0: i32) -> (i32, i32) {
    %c0_i32 = arith.constant 0 : i32
    %c0_i32_0 = arith.constant 0 : i32
    return %arg0, %c0_i32 : i32, i32
  }
  func.func @transform_3(%arg0: i32) -> (i32, i32) {
    %c0_i32 = arith.constant 0 : i32
    %c0_i32_0 = arith.constant 0 : i32
    %c0_i32_1 = arith.constant 0 : i32
    return %c0_i32, %c0_i32_0 : i32, i32
  }
  func.func @transform_4(%arg0: i32) -> (i32, i32) {
    %c0_i32 = arith.constant 0 : i32
    %c0_i32_0 = arith.constant 0 : i32
    %c0_i32_1 = arith.constant 0 : i32
    return %c0_i32, %c0_i32_0 : i32, i32
  }
  func.func @transform_5(%arg0: i32) -> (i32, i32) {
    %c0_i32 = arith.constant 0 : i32
    %c0_i32_0 = arith.constant 0 : i32
    return %arg0, %c0_i32 : i32, i32
  }
}

module attributes {stable_mosaic.version = 11 : i64} {
  func.func @_matmul_bn_single_kernel(%arg0: i32, %arg1: memref<128x1152xbf16, #tpu.memory_space<vmem>>, %arg2: memref<1152x128xbf16, #tpu.memory_space<vmem>>, %arg3: memref<1x128xf32, #tpu.memory_space<vmem>>, %arg4: memref<128x128xbf16, #tpu.memory_space<vmem>>) attributes {dimension_semantics = [#tpu.dimension_semantics<parallel>], iteration_bounds = array<i64: 1>, scalar_prefetch = 0 : i64, scratch_operands = 0 : i64, tpu.core_type = #tpu.core_type<tc>, window_params = [{transform_indices = @transform_0, window_bounds = array<i64: 128, 1152>}, {pipeline_mode = #tpu.pipeline_mode<synchronous>, transform_indices = @transform_1, window_bounds = array<i64: 1152, 128>}, {pipeline_mode = #tpu.pipeline_mode<synchronous>, transform_indices = @transform_2, window_bounds = array<i64: 1, 128>}, {transform_indices = @transform_3, window_bounds = array<i64: 128, 128>}]} {
    %c0 = arith.constant 0 : index
    %c0_0 = arith.constant 0 : index
    %0 = vector.load %arg1[%c0, %c0_0] : memref<128x1152xbf16, #tpu.memory_space<vmem>>, vector<128x1152xbf16>
    %c0_1 = arith.constant 0 : index
    %c0_2 = arith.constant 0 : index
    %1 = vector.load %arg2[%c0_1, %c0_2] : memref<1152x128xbf16, #tpu.memory_space<vmem>>, vector<1152x128xbf16>
    %cst = arith.constant dense<0.000000e+00> : vector<128x128xf32>
    %2 = tpu.matmul %0, %1, %cst {dimension_numbers = #tpu.dot_dimension_numbers<[1], [0], [0], [1], [0, 0, 1, 1], [], []>} : vector<128x1152xbf16>, vector<1152x128xbf16>, vector<128x128xf32> -> vector<128x128xf32>
    %c0_3 = arith.constant 0 : index
    %c0_4 = arith.constant 0 : index
    %3 = vector.load %arg3[%c0_3, %c0_4] : memref<1x128xf32, #tpu.memory_space<vmem>>, vector<1x128xf32>
    %4 = vector.broadcast %3 : vector<1x128xf32> to vector<128x128xf32>
    %5 = arith.addf %2, %4 : vector<128x128xf32>
    %cst_5 = arith.constant 0.000000e+00 : f32
    %6 = vector.broadcast %cst_5 : f32 to vector<128x128xf32>
    %7 = arith.maximumf %5, %6 : vector<128x128xf32>
    %8 = arith.truncf %7 : vector<128x128xf32> to vector<128x128xbf16>
    %c0_6 = arith.constant 0 : index
    %c0_7 = arith.constant 0 : index
    %9 = vector.load %arg4[%c0_6, %c0_7] : memref<128x128xbf16, #tpu.memory_space<vmem>>, vector<128x128xbf16>
    tpu.vector_store %arg4[%c0_6, %c0_7], %8 {strides = array<i32>} : memref<128x128xbf16, #tpu.memory_space<vmem>>, vector<128x128xbf16>,
    return
  }
  func.func @transform_0(%arg0: i32) -> (i32, i32) {
    %c0_i32 = arith.constant 0 : i32
    %c0_i32_0 = arith.constant 0 : i32
    return %arg0, %c0_i32 : i32, i32
  }
  func.func @transform_1(%arg0: i32) -> (i32, i32) {
    %c0_i32 = arith.constant 0 : i32
    %c0_i32_0 = arith.constant 0 : i32
    %c0_i32_1 = arith.constant 0 : i32
    return %c0_i32, %c0_i32_0 : i32, i32
  }
  func.func @transform_2(%arg0: i32) -> (i32, i32) {
    %c0_i32 = arith.constant 0 : i32
    %c0_i32_0 = arith.constant 0 : i32
    %c0_i32_1 = arith.constant 0 : i32
    return %c0_i32, %c0_i32_0 : i32, i32
  }
  func.func @transform_3(%arg0: i32) -> (i32, i32) {
    %c0_i32 = arith.constant 0 : i32
    %c0_i32_0 = arith.constant 0 : i32
    return %arg0, %c0_i32 : i32, i32
  }
}

</mosaic_0001>

<bundles_post_ra>
// kernel: res_unit_forward.3
= control target key start
LH: loop header
LB: loop body
LE: loop exit
PB: predicated region body
PF: predicated region fallthrough
CT: control target
= control target key end

     0   :  { %s1126_s12 = smov 0   ;;  %s1247_s0 = inlined_call_operand.vmem [shape: bf16[512,128], index: 0, kind: input, shape index: {}]   ;;  %s1248_s1 = inlined_call_operand.vmem [shape: bf16[128,128], index: 1, kind: input, shape index: {}]   ;;  %s1249_s2 = inlined_call_operand.vmem [shape: f32[1,128], index: 2, kind: input, shape index: {}]   ;;  %s1250_s3 = inlined_call_operand.vmem [shape: bf16[512,128], index: 3, kind: output, shape index: {}]  }
   0x1 LB: > { %s783_s13 = sadd.s32 4294967295, %s1104_s12   ;;  %p787_p0 = scmp.ge.s32.totalorder %s1104_s12, 1  ;;  %s1104_s12 = sphi %s1126_s12, %s13_s12  }
   0x2   : > { %p138_p1 = scmp.lt.s32.totalorder %s1104_s12, 3 }
   0x4   : > { %p139_p2 = pnand %p787_p0, %p138_p1 }
   0x5   : > { %s788_s16 = sshll.u32 (!%p139_p2), %s783_s13, 5 }
   0x6   : > { %142 = sbr.rel (%p139_p2) target bundleno = 274 (0x112), region = 32  ;;  %p163_p3 = scmp.lt.s32.totalorder (!%p139_p2), %s788_s16, 63 }
   0xb   : > { %v1074_v0 = vld [vmem:[%s1248_s1 + $0x38] sm:$0xff]   ;;  %v1075_v1 = vld [vmem:[%s1248_s1 + $0x30] sm:$0xff]   ;;  %s1252_s16 = smov (!%p163_p3, %s788_s16), 63  ;;  %v1076_v2 = vld [vmem:[%s1248_s1 + $0x28] sm:$0xff]  }
   0xc   : > { %1002 = vmatprep.subr.bf16.mxu0 %v1074_v0  ;;  %1050 = vmatprep.subr.bf16.mxu1 %v1074_v0  ;;  %s789_s21 = sshll.u32 %s1252_s16, 2  ;;  %v1077_v3 = vld [vmem:[%s1248_s1 + $0x20] sm:$0xff]   ;;  %v1078_v6 = vld [vmem:[%s1248_s1 + $0x18] sm:$0xff]   ;;  %v1079_v7 = vld [vmem:[%s1248_s1 + $0x10] sm:$0xff]  }
   0xd   : > { %1003 = vmatpush3.bf16.msra.mxu0 %v1074_v0  ;;  %1058 = vmatpush3.bf16.msra.mxu1 %v1074_v0  ;;  %s1151_s24 = scalar_lea.vmem %s1247_s0, %s789_s21  ;;  %v1080_v8 = vld [vmem:[%s1248_s1 + $0x8] sm:$0xff]   ;;  %v1081_v9 = vld [vmem:[%s1248_s1] sm:$0xff]   ;;  %s1202_s13 = scalar_lea.vmem %s1250_s3, %s789_s21 }
   0xe   : > { %1004 = vmatprep.subr.bf16.mxu0 %v1075_v1  ;;  %1051 = vmatprep.subr.bf16.mxu1 %v1075_v1  ;;  %v1082_v4 = vld [vmem:[%s1151_s24] sm:$0xff]   ;;  %v1084_v10 = vld [vmem:[%s1151_s24 + $0x8] sm:$0xff]   ;;  %v1086_v12 = vld [vmem:[%s1151_s24 + $0x10] sm:$0xff]  }
   0xf   : > { %v1083_v5 = vld [vmem:[%s1151_s24 + $0x40] sm:$0xff]   ;;  %1018 = vmatprep.mubr.bf16.mxu0 %v1082_v4  ;;  %v1085_v11 = vld [vmem:[%s1151_s24 + $0x48] sm:$0xff]   ;;  %v1087_v13 = vld [vmem:[%s1151_s24 + $0x50] sm:$0xff]  }
  0x10   : > { %1034 = vmatprep.mubr.bf16.mxu1 %v1083_v5  ;;  %v1088_v14 = vld [vmem:[%s1151_s24 + $0x18] sm:$0xff]   ;;  %v1090_v16 = vld [vmem:[%s1151_s24 + $0x20] sm:$0xff]   ;;  %v1092_v18 = vld [vmem:[%s1151_s24 + $0x28] sm:$0xff]  }
  0x11   : > { %1005 = vmatpush3.bf16.msra.mxu0 %v1075_v1  ;;  %1059 = vmatpush3.bf16.msra.mxu1 %v1075_v1  ;;  %v1089_v15 = vld [vmem:[%s1151_s24 + $0x58] sm:$0xff]   ;;  %v1091_v17 = vld [vmem:[%s1151_s24 + $0x60] sm:$0xff]   ;;  %v1093_v19 = vld [vmem:[%s1151_s24 + $0x68] sm:$0xff]  }
  0x12   : > { %1006 = vmatprep.subr.bf16.mxu0 %v1076_v2  ;;  %1052 = vmatprep.subr.bf16.mxu1 %v1076_v2  ;;  %v1094_v20 = vld [vmem:[%s1151_s24 + $0x30] sm:$0xff]   ;;  %v1096_v22 = vld [vmem:[%s1151_s24 + $0x38] sm:$0xff]   ;;  %v1187_v24 = vld [vmem:[%s1249_s2] ss:$0 sm:$0xff] }
  0x13   : > { %v1095_v21 = vld [vmem:[%s1151_s24 + $0x70] sm:$0xff]   ;;  %v1097_v23 = vld [vmem:[%s1151_s24 + $0x78] sm:$0xff]  }
  0x15   : > { %1007 = vmatpush3.bf16.msra.mxu0 %v1076_v2  ;;  %1060 = vmatpush3.bf16.msra.mxu1 %v1076_v2 }
  0x16   : > { %1008 = vmatprep.subr.bf16.mxu0 %v1077_v3  ;;  %1053 = vmatprep.subr.bf16.mxu1 %v1077_v3 }
  0x19   : > { %1009 = vmatpush3.bf16.msra.mxu0 %v1077_v3  ;;  %1061 = vmatpush3.bf16.msra.mxu1 %v1077_v3 }
  0x1a   : > { %1010 = vmatprep.subr.bf16.mxu0 %v1078_v6  ;;  %1054 = vmatprep.subr.bf16.mxu1 %v1078_v6 }
  0x1d   : > { %1011 = vmatpush3.bf16.msra.mxu0 %v1078_v6  ;;  %1062 = vmatpush3.bf16.msra.mxu1 %v1078_v6 }
  0x1e   : > { %1012 = vmatprep.subr.bf16.mxu0 %v1079_v7  ;;  %1055 = vmatprep.subr.bf16.mxu1 %v1079_v7 }
  0x21   : > { %1013 = vmatpush3.bf16.msra.mxu0 %v1079_v7  ;;  %1063 = vmatpush3.bf16.msra.mxu1 %v1079_v7 }
  0x22   : > { %1014 = vmatprep.subr.bf16.mxu0 %v1080_v8  ;;  %1056 = vmatprep.subr.bf16.mxu1 %v1080_v8 }
  0x25   : > { %1015 = vmatpush3.bf16.msra.mxu0 %v1080_v8  ;;  %1064 = vmatpush3.bf16.msra.mxu1 %v1080_v8 }
  0x26   : > { %1016 = vmatprep.subr.bf16.mxu0 %v1081_v9  ;;  %1057 = vmatprep.subr.bf16.mxu1 %v1081_v9 }
  0x29   : > { %1017 = vmatpush3.bf16.msra.mxu0 %v1081_v9  ;;  %1065 = vmatpush3.bf16.msra.mxu1 %v1081_v9 }
  0x2c   : > { %1019 = vmatmul.mubr.bf16.vlgmr.msra.gmra.mxu0 %v1084_v10  ;;  %1035 = vmatmul.mubr.bf16.vlgmr.msra.gmra.mxu1 %v1085_v11 }
  0x2d   : > { %1022 = vmatprep.mubr.bf16.mxu0 %v1086_v12  ;;  %1038 = vmatprep.mubr.bf16.mxu1 %v1087_v13 }
  0x34   : > { %1023 = vmatmul.mubr.bf16.gmra.mxu0 %v1088_v14  ;;  %1039 = vmatmul.mubr.bf16.gmra.mxu1 %v1089_v15 }
  0x35   : > { %1026 = vmatprep.mubr.bf16.mxu0 %v1090_v16  ;;  %1042 = vmatprep.mubr.bf16.mxu1 %v1091_v17 }
  0x3c   : > { %1027 = vmatmul.mubr.bf16.gmra.mxu0 %v1092_v18  ;;  %1043 = vmatmul.mubr.bf16.gmra.mxu1 %v1093_v19 }
  0x3d   : > { %1030 = vmatprep.mubr.bf16.mxu0 %v1094_v20  ;;  %1046 = vmatprep.mubr.bf16.mxu1 %v1095_v21 }
  0x44   : > { %1031 = vmatmul.mubr.bf16.gmra.mxu0 %v1096_v22  ;;  %1047 = vmatmul.mubr.bf16.gmra.mxu1 %v1097_v23 }
  0xec   : > { %v1020_v25 = vpop.f32.mrf.mxu0  ;;  %v1036_v26 = vpop.f32.mrf.mxu1 }
  0xed   : > { %v417_v27 = vadd.f32 %v1020_v25, %v1187_v24  ;;  %v481_v28 = vadd.f32 %v1036_v26, %v1187_v24 }
  0xee   : > { %v408_v29 = vpop.f32.mrf.mxu0  ;;  %v472_v30 = vpop.f32.mrf.mxu1 }
  0xef   : > { %v409_v31 = vadd.f32 %v1187_v24, %v408_v29  ;;  %v473_v32 = vadd.f32 %v1187_v24, %v472_v30  ;;  %v537_v37 = vmax.f32 %v417_v27, 0.0  ;;  %v553_v38 = vmax.f32 %v481_v28, 0.0 }
  0xf0   : > { %v1021_v33 = vpop.f32.mrf.mxu0  ;;  %v1037_v34 = vpop.f32.mrf.mxu1 }
  0xf1   : > { %v420_v35 = vadd.f32 %v1021_v33, %v1187_v24  ;;  %v484_v36 = vadd.f32 %v1037_v34, %v1187_v24  ;;  %v535_v45 = vmax.f32 %v409_v31, 0.0  ;;  %v551_v46 = vmax.f32 %v473_v32, 0.0 }
  0xf2   : > { %v411_v39 = vpop.f32.mrf.mxu0  ;;  %v475_v40 = vpop.f32.mrf.mxu1 }
  0xf3   : > { %v538_v41 = vmax.f32 %v420_v35, 0.0  ;;  %v554_v42 = vmax.f32 %v484_v36, 0.0  ;;  %v412_v43 = vadd.f32 %v1187_v24, %v411_v39  ;;  %v476_v44 = vadd.f32 %v1187_v24, %v475_v40 }
  0xf4   : > { %v1024_v47 = vpop.f32.mrf.mxu0  ;;  %v1040_v48 = vpop.f32.mrf.mxu1 }
  0xf5   : > { %v891_v49 = vpack.c.bf16 %v538_v41, %v537_v37  ;;  %v931_v50 = vpack.c.bf16 %v554_v42, %v553_v38  ;;  %v536_v51 = vmax.f32 %v412_v43, 0.0  ;;  %v552_v52 = vmax.f32 %v476_v44, 0.0 }
  0xf6   : > { %v433_v53 = vadd.f32 %v1024_v47, %v1187_v24  ;;  %v497_v54 = vadd.f32 %v1040_v48, %v1187_v24  ;;  %v424_v55 = vpop.f32.mrf.mxu0  ;;  %v488_v56 = vpop.f32.mrf.mxu1 }
  0xf7   : > { %963 = vst [vmem:[%s1202_s13 + $0x8] sm:$0xff] %v891_v49   ;;  %971 = vst [vmem:[%s1202_s13 + $0x48] sm:$0xff] %v931_v50   ;;  %v886_v57 = vpack.c.bf16 %v536_v51, %v535_v45  ;;  %v926_v58 = vpack.c.bf16 %v552_v52, %v551_v46  ;;  %v425_v59 = vadd.f32 %v1187_v24, %v424_v55 }
  0xf8   : > { %v489_v60 = vadd.f32 %v1187_v24, %v488_v56  ;;  %v1025_v61 = vpop.f32.mrf.mxu0  ;;  %v1041_v62 = vpop.f32.mrf.mxu1  ;;  %v541_v1 = vmax.f32 %v433_v53, 0.0  ;;  %v557_v2 = vmax.f32 %v497_v54, 0.0 }
  0xf9   : > { %887 = vst [vmem:[%s1202_s13] sm:$0xff] %v886_v57   ;;  %970 = vst [vmem:[%s1202_s13 + $0x40] sm:$0xff] %v926_v58   ;;  %v436_v63 = vadd.f32 %v1025_v61, %v1187_v24  ;;  %v500_v0 = vadd.f32 %v1041_v62, %v1187_v24  ;;  %v539_v9 = vmax.f32 %v425_v59, 0.0 }
  0xfa   : > { %v427_v3 = vpop.f32.mrf.mxu0  ;;  %v491_v4 = vpop.f32.mrf.mxu1  ;;  %v555_v10 = vmax.f32 %v489_v60, 0.0 }
  0xfb   : > { %v542_v5 = vmax.f32 %v436_v63, 0.0  ;;  %v558_v6 = vmax.f32 %v500_v0, 0.0  ;;  %v428_v7 = vadd.f32 %v1187_v24, %v427_v3  ;;  %v492_v8 = vadd.f32 %v1187_v24, %v491_v4 }
  0xfc   : > { %v1028_v11 = vpop.f32.mrf.mxu0  ;;  %v1044_v12 = vpop.f32.mrf.mxu1 }
  0xfd   : > { %v901_v13 = vpack.c.bf16 %v542_v5, %v541_v1  ;;  %v941_v14 = vpack.c.bf16 %v558_v6, %v557_v2  ;;  %v540_v15 = vmax.f32 %v428_v7, 0.0  ;;  %v556_v16 = vmax.f32 %v492_v8, 0.0 }
  0xfe   : > { %v449_v17 = vadd.f32 %v1028_v11, %v1187_v24  ;;  %v513_v18 = vadd.f32 %v1044_v12, %v1187_v24  ;;  %v440_v19 = vpop.f32.mrf.mxu0  ;;  %v504_v20 = vpop.f32.mrf.mxu1 }
  0xff   : > { %965 = vst [vmem:[%s1202_s13 + $0x18] sm:$0xff] %v901_v13   ;;  %973 = vst [vmem:[%s1202_s13 + $0x58] sm:$0xff] %v941_v14   ;;  %v896_v21 = vpack.c.bf16 %v540_v15, %v539_v9  ;;  %v936_v22 = vpack.c.bf16 %v556_v16, %v555_v10  ;;  %v441_v23 = vadd.f32 %v1187_v24, %v440_v19 }
 0x100   : > { %v505_v25 = vadd.f32 %v1187_v24, %v504_v20  ;;  %v1029_v26 = vpop.f32.mrf.mxu0  ;;  %v1045_v27 = vpop.f32.mrf.mxu1  ;;  %v545_v30 = vmax.f32 %v449_v17, 0.0  ;;  %v561_v31 = vmax.f32 %v513_v18, 0.0 }
 0x101   : > { %964 = vst [vmem:[%s1202_s13 + $0x10] sm:$0xff] %v896_v21   ;;  %972 = vst [vmem:[%s1202_s13 + $0x50] sm:$0xff] %v936_v22   ;;  %v452_v28 = vadd.f32 %v1029_v26, %v1187_v24  ;;  %v516_v29 = vadd.f32 %v1045_v27, %v1187_v24  ;;  %v543_v38 = vmax.f32 %v441_v23, 0.0 }
 0x102   : > { %v443_v32 = vpop.f32.mrf.mxu0  ;;  %v507_v33 = vpop.f32.mrf.mxu1  ;;  %v559_v39 = vmax.f32 %v505_v25, 0.0 }
 0x103   : > { %v546_v34 = vmax.f32 %v452_v28, 0.0  ;;  %v562_v35 = vmax.f32 %v516_v29, 0.0  ;;  %v444_v36 = vadd.f32 %v1187_v24, %v443_v32  ;;  %v508_v37 = vadd.f32 %v1187_v24, %v507_v33 }
 0x104   : > { %v1032_v40 = vpop.f32.mrf.mxu0  ;;  %v1048_v41 = vpop.f32.mrf.mxu1 }
 0x105   : > { %v911_v42 = vpack.c.bf16 %v546_v34, %v545_v30  ;;  %v951_v43 = vpack.c.bf16 %v562_v35, %v561_v31  ;;  %v544_v44 = vmax.f32 %v444_v36, 0.0  ;;  %v560_v45 = vmax.f32 %v508_v37, 0.0 }
 0x106   : > { %v465_v46 = vadd.f32 %v1032_v40, %v1187_v24  ;;  %v529_v47 = vadd.f32 %v1048_v41, %v1187_v24  ;;  %v456_v48 = vpop.f32.mrf.mxu0  ;;  %v520_v49 = vpop.f32.mrf.mxu1 }
 0x107   : > { %967 = vst [vmem:[%s1202_s13 + $0x28] sm:$0xff] %v911_v42   ;;  %975 = vst [vmem:[%s1202_s13 + $0x68] sm:$0xff] %v951_v43   ;;  %v906_v50 = vpack.c.bf16 %v544_v44, %v543_v38  ;;  %v946_v51 = vpack.c.bf16 %v560_v45, %v559_v39  ;;  %v457_v52 = vadd.f32 %v1187_v24, %v456_v48 }
 0x108   : > { %v521_v53 = vadd.f32 %v1187_v24, %v520_v49  ;;  %v1033_v54 = vpop.f32.mrf.mxu0  ;;  %v1049_v55 = vpop.f32.mrf.mxu1  ;;  %v549_v58 = vmax.f32 %v465_v46, 0.0  ;;  %v565_v59 = vmax.f32 %v529_v47, 0.0 }
 0x109   : > { %966 = vst [vmem:[%s1202_s13 + $0x20] sm:$0xff] %v906_v50   ;;  %974 = vst [vmem:[%s1202_s13 + $0x60] sm:$0xff] %v946_v51   ;;  %v468_v56 = vadd.f32 %v1033_v54, %v1187_v24  ;;  %v532_v57 = vadd.f32 %v1049_v55, %v1187_v24  ;;  %v547_v2 = vmax.f32 %v457_v52, 0.0 }
 0x10a   : > { %v459_v60 = vpop.f32.mrf.mxu0  ;;  %v523_v61 = vpop.f32.mrf.mxu1  ;;  %v563_v3 = vmax.f32 %v521_v53, 0.0 }
 0x10b   : > { %v550_v62 = vmax.f32 %v468_v56, 0.0  ;;  %v566_v63 = vmax.f32 %v532_v57, 0.0  ;;  %v460_v0 = vadd.f32 %v1187_v24, %v459_v60  ;;  %v524_v1 = vadd.f32 %v1187_v24, %v523_v61 }
 0x10d   : > { %v921_v4 = vpack.c.bf16 %v550_v62, %v549_v58  ;;  %v961_v5 = vpack.c.bf16 %v566_v63, %v565_v59  ;;  %v548_v6 = vmax.f32 %v460_v0, 0.0  ;;  %v564_v7 = vmax.f32 %v524_v1, 0.0 }
 0x10f   : > { %969 = vst [vmem:[%s1202_s13 + $0x38] sm:$0xff] %v921_v4   ;;  %977 = vst [vmem:[%s1202_s13 + $0x78] sm:$0xff] %v961_v5   ;;  %v916_v8 = vpack.c.bf16 %v548_v6, %v547_v2  ;;  %v956_v9 = vpack.c.bf16 %v564_v7, %v563_v3 }
 0x111   : > { %968 = vst [vmem:[%s1202_s13 + $0x30] sm:$0xff] %v916_v8   ;;  %976 = vst [vmem:[%s1202_s13 + $0x70] sm:$0xff] %v956_v9  }
 0x112 PF: > { %s13_s12 = sadd.s32 1, %s1104_s12  }
 0x113   : > { %p10_p4 = scmp.ge.s32.totalorder %s13_s12, 4  }
 0x115   :  { %12 = sbr.rel (!%p10_p4) target bundleno = 1 (0x1), region = 62 }

// kernel: res_unit_forward.5
= control target key start
LH: loop header
LB: loop body
LE: loop exit
PB: predicated region body
PF: predicated region fallthrough
CT: control target
= control target key end

     0   :  { %s886_s3 = inlined_call_operand.vmem [shape: bf16[128,128], index: 3, kind: input, shape index: {}]   ;;  %s887_s1 = inlined_call_operand.vmem [shape: bf16[128,128], index: 1, kind: input, shape index: {}]   ;;  %s888_s2 = inlined_call_operand.vmem [shape: bf16[128,128], index: 2, kind: input, shape index: {}]   ;;  %s889_s0 = inlined_call_operand.vmem [shape: bf16[128,128], index: 0, kind: input, shape index: {}]   ;;  %s890_s4 = inlined_call_operand.vmem [shape: f32[1,128], index: 4, kind: input, shape index: {}]   ;;  %s891_s5 = inlined_call_operand.vmem [shape: f32[128,128], index: 5, kind: output, shape index: {}]  }
   0x1   :  { %v659_v0 = vld [vmem:[%s886_s3 + $0x38] sm:$0xff]   ;;  %v661_v2 = vld [vmem:[%s886_s3 + $0x30] sm:$0xff]   ;;  %v663_v4 = vld [vmem:[%s886_s3 + $0x28] sm:$0xff]  }
   0x2   :  { %v660_v1 = vld [vmem:[%s887_s1 + $0x38] sm:$0xff]   ;;  %595 = vmatprep.subr.bf16.mxu0 %v659_v0  ;;  %v662_v3 = vld [vmem:[%s887_s1 + $0x30] sm:$0xff]   ;;  %v664_v5 = vld [vmem:[%s887_s1 + $0x28] sm:$0xff]  }
   0x3   :  { %627 = vmatprep.subr.bf16.mxu1 %v660_v1  ;;  %596 = vmatpush3.bf16.msra.mxu0 %v659_v0  ;;  %v665_v6 = vld [vmem:[%s886_s3 + $0x20] sm:$0xff]   ;;  %v667_v8 = vld [vmem:[%s886_s3 + $0x18] sm:$0xff]   ;;  %v669_v10 = vld [vmem:[%s886_s3 + $0x10] sm:$0xff]  }
   0x4   :  { %628 = vmatpush3.bf16.msra.mxu1 %v660_v1  ;;  %597 = vmatprep.subr.bf16.mxu0 %v661_v2  ;;  %v666_v7 = vld [vmem:[%s887_s1 + $0x20] sm:$0xff]   ;;  %v668_v9 = vld [vmem:[%s887_s1 + $0x18] sm:$0xff]   ;;  %v670_v11 = vld [vmem:[%s887_s1 + $0x10] sm:$0xff]  }
   0x5   :  { %629 = vmatprep.subr.bf16.mxu1 %v662_v3  ;;  %v675_v12 = vld [vmem:[%s888_s2] sm:$0xff]   ;;  %v671_v14 = vld [vmem:[%s886_s3 + $0x8] sm:$0xff]   ;;  %v679_v20 = vld [vmem:[%s888_s2 + $0x10] sm:$0xff]  }
   0x6   :  { %v676_v13 = vld [vmem:[%s889_s0] sm:$0xff]   ;;  %611 = vmatprep.mubr.bf16.mxu0 %v675_v12  ;;  %v672_v15 = vld [vmem:[%s887_s1 + $0x8] sm:$0xff]   ;;  %v680_v21 = vld [vmem:[%s889_s0 + $0x10] sm:$0xff]  }
   0x7   :  { %598 = vmatpush3.bf16.msra.mxu0 %v661_v2  ;;  %643 = vmatprep.mubr.bf16.mxu1 %v676_v13  ;;  %v673_v16 = vld [vmem:[%s886_s3] sm:$0xff]   ;;  %v677_v18 = vld [vmem:[%s888_s2 + $0x8] sm:$0xff]   ;;  %v681_v22 = vld [vmem:[%s888_s2 + $0x18] sm:$0xff]  }
   0x8   :  { %630 = vmatpush3.bf16.msra.mxu1 %v662_v3  ;;  %599 = vmatprep.subr.bf16.mxu0 %v663_v4  ;;  %v674_v17 = vld [vmem:[%s887_s1] sm:$0xff]   ;;  %v678_v19 = vld [vmem:[%s889_s0 + $0x8] sm:$0xff]   ;;  %v682_v23 = vld [vmem:[%s889_s0 + $0x18] sm:$0xff]  }
   0x9   :  { %631 = vmatprep.subr.bf16.mxu1 %v664_v5  ;;  %v683_v24 = vld [vmem:[%s888_s2 + $0x20] sm:$0xff]   ;;  %v685_v26 = vld [vmem:[%s888_s2 + $0x28] sm:$0xff]   ;;  %v687_v28 = vld [vmem:[%s888_s2 + $0x30] sm:$0xff]  }
   0xa   :  { %v684_v25 = vld [vmem:[%s889_s0 + $0x20] sm:$0xff]   ;;  %v686_v27 = vld [vmem:[%s889_s0 + $0x28] sm:$0xff]   ;;  %v688_v29 = vld [vmem:[%s889_s0 + $0x30] sm:$0xff]  }
   0xb   :  { %600 = vmatpush3.bf16.msra.mxu0 %v663_v4  ;;  %v689_v30 = vld [vmem:[%s888_s2 + $0x38] sm:$0xff]   ;;  %v820_v34 = vld [vmem:[%s890_s4] ss:$0 sm:$0xff] }
   0xc   :  { %632 = vmatpush3.bf16.msra.mxu1 %v664_v5  ;;  %601 = vmatprep.subr.bf16.mxu0 %v665_v6  ;;  %v690_v31 = vld [vmem:[%s889_s0 + $0x38] sm:$0xff]  }
   0xd   :  { %633 = vmatprep.subr.bf16.mxu1 %v666_v7 }
   0xf   :  { %602 = vmatpush3.bf16.msra.mxu0 %v665_v6 }
  0x10   :  { %634 = vmatpush3.bf16.msra.mxu1 %v666_v7  ;;  %603 = vmatprep.subr.bf16.mxu0 %v667_v8 }
  0x11   :  { %635 = vmatprep.subr.bf16.mxu1 %v668_v9 }
  0x13   :  { %604 = vmatpush3.bf16.msra.mxu0 %v667_v8 }
  0x14   :  { %636 = vmatpush3.bf16.msra.mxu1 %v668_v9  ;;  %605 = vmatprep.subr.bf16.mxu0 %v669_v10 }
  0x15   :  { %637 = vmatprep.subr.bf16.mxu1 %v670_v11 }
  0x17   :  { %606 = vmatpush3.bf16.msra.mxu0 %v669_v10 }
  0x18   :  { %638 = vmatpush3.bf16.msra.mxu1 %v670_v11  ;;  %607 = vmatprep.subr.bf16.mxu0 %v671_v14 }
  0x19   :  { %639 = vmatprep.subr.bf16.mxu1 %v672_v15 }
  0x1b   :  { %608 = vmatpush3.bf16.msra.mxu0 %v671_v14 }
  0x1c   :  { %640 = vmatpush3.bf16.msra.mxu1 %v672_v15  ;;  %609 = vmatprep.subr.bf16.mxu0 %v673_v16 }
  0x1d   :  { %641 = vmatprep.subr.bf16.mxu1 %v674_v17 }
  0x1f   :  { %610 = vmatpush3.bf16.msra.mxu0 %v673_v16 }
  0x20   :  { %642 = vmatpush3.bf16.msra.mxu1 %v674_v17 }
  0x22   :  { %612 = vmatmul.mubr.bf16.vlgmr.msra.gmra.mxu0 %v677_v18 }
  0x23   :  { %644 = vmatmul.mubr.bf16.vlgmr.msra.gmra.mxu1 %v678_v19  ;;  %615 = vmatprep.mubr.bf16.mxu0 %v679_v20 }
  0x24   :  { %647 = vmatprep.mubr.bf16.mxu1 %v680_v21 }
  0x2a   :  { %616 = vmatmul.mubr.bf16.gmra.mxu0 %v681_v22 }
  0x2b   :  { %648 = vmatmul.mubr.bf16.gmra.mxu1 %v682_v23  ;;  %619 = vmatprep.mubr.bf16.mxu0 %v683_v24 }
  0x2c   :  { %651 = vmatprep.mubr.bf16.mxu1 %v684_v25 }
  0x32   :  { %620 = vmatmul.mubr.bf16.gmra.mxu0 %v685_v26 }
  0x33   :  { %652 = vmatmul.mubr.bf16.gmra.mxu1 %v686_v27  ;;  %623 = vmatprep.mubr.bf16.mxu0 %v687_v28 }
  0x34   :  { %655 = vmatprep.mubr.bf16.mxu1 %v688_v29 }
  0x3a   :  { %624 = vmatmul.mubr.bf16.gmra.mxu0 %v689_v30 }
  0x3b   :  { %656 = vmatmul.mubr.bf16.gmra.mxu1 %v690_v31 }
  0xe2   :  { %v613_v32 = vpop.f32.mrf.mxu0 }
  0xe3   :  { %v645_v33 = vpop.f32.mrf.mxu1 }
  0xe4   :  { %v417_v35 = vadd.f32 %v645_v33, %v613_v32  ;;  %v215_v36 = vpop.f32.mrf.mxu0 }
  0xe5   :  { %v408_v37 = vpop.f32.mrf.mxu1 }
  0xe6   :  { %v480_v38 = vadd.f32 %v820_v34, %v417_v35  ;;  %v409_v39 = vadd.f32 %v408_v37, %v215_v36  ;;  %v614_v40 = vpop.f32.mrf.mxu0 }
  0xe7   :  { %v646_v41 = vpop.f32.mrf.mxu1 }
  0xe8   :  { %v496_v42 = vmax.f32 %v480_v38, 0.0  ;;  %v478_v43 = vadd.f32 %v820_v34, %v409_v39  ;;  %v420_v44 = vadd.f32 %v646_v41, %v614_v40  ;;  %v218_v45 = vpop.f32.mrf.mxu0 }
  0xe9   :  { %v411_v46 = vpop.f32.mrf.mxu1 }
  0xea   :  { %512 = vst [vmem:[%s891_s5 + $0x10] sm:$0xff] %v496_v42  ;;  %v494_v47 = vmax.f32 %v478_v43, 0.0  ;;  %v481_v48 = vadd.f32 %v820_v34, %v420_v44  ;;  %v412_v49 = vadd.f32 %v411_v46, %v218_v45  ;;  %v617_v50 = vpop.f32.mrf.mxu0 }
  0xeb   :  { %v649_v51 = vpop.f32.mrf.mxu1 }
  0xec   :  { %510 = vst [vmem:[%s891_s5] sm:$0xff] %v494_v47  ;;  %v497_v52 = vmax.f32 %v481_v48, 0.0  ;;  %v479_v53 = vadd.f32 %v820_v34, %v412_v49  ;;  %v433_v54 = vadd.f32 %v649_v51, %v617_v50  ;;  %v231_v55 = vpop.f32.mrf.mxu0 }
  0xed   :  { %v424_v56 = vpop.f32.mrf.mxu1 }
  0xee   :  { %513 = vst [vmem:[%s891_s5 + $0x18] sm:$0xff] %v497_v52  ;;  %v495_v57 = vmax.f32 %v479_v53, 0.0  ;;  %v484_v58 = vadd.f32 %v820_v34, %v433_v54  ;;  %v425_v59 = vadd.f32 %v424_v56, %v231_v55  ;;  %v618_v60 = vpop.f32.mrf.mxu0 }
  0xef   :  { %v650_v61 = vpop.f32.mrf.mxu1 }
  0xf0   :  { %511 = vst [vmem:[%s891_s5 + $0x8] sm:$0xff] %v495_v57  ;;  %v500_v62 = vmax.f32 %v484_v58, 0.0  ;;  %v482_v63 = vadd.f32 %v820_v34, %v425_v59  ;;  %v436_v0 = vadd.f32 %v650_v61, %v618_v60  ;;  %v234_v1 = vpop.f32.mrf.mxu0 }
  0xf1   :  { %v427_v2 = vpop.f32.mrf.mxu1 }
  0xf2   :  { %516 = vst [vmem:[%s891_s5 + $0x30] sm:$0xff] %v500_v62  ;;  %v498_v3 = vmax.f32 %v482_v63, 0.0  ;;  %v485_v4 = vadd.f32 %v820_v34, %v436_v0  ;;  %v428_v5 = vadd.f32 %v427_v2, %v234_v1  ;;  %v621_v6 = vpop.f32.mrf.mxu0 }
  0xf3   :  { %v653_v7 = vpop.f32.mrf.mxu1 }
  0xf4   :  { %514 = vst [vmem:[%s891_s5 + $0x20] sm:$0xff] %v498_v3  ;;  %v501_v8 = vmax.f32 %v485_v4, 0.0  ;;  %v483_v9 = vadd.f32 %v820_v34, %v428_v5  ;;  %v449_v10 = vadd.f32 %v653_v7, %v621_v6  ;;  %v247_v11 = vpop.f32.mrf.mxu0 }
  0xf5   :  { %v440_v12 = vpop.f32.mrf.mxu1 }
  0xf6   :  { %517 = vst [vmem:[%s891_s5 + $0x38] sm:$0xff] %v501_v8  ;;  %v499_v13 = vmax.f32 %v483_v9, 0.0  ;;  %v488_v14 = vadd.f32 %v820_v34, %v449_v10  ;;  %v441_v15 = vadd.f32 %v440_v12, %v247_v11  ;;  %v622_v16 = vpop.f32.mrf.mxu0 }
  0xf7   :  { %v654_v17 = vpop.f32.mrf.mxu1 }
  0xf8   :  { %515 = vst [vmem:[%s891_s5 + $0x28] sm:$0xff] %v499_v13  ;;  %v504_v18 = vmax.f32 %v488_v14, 0.0  ;;  %v486_v19 = vadd.f32 %v820_v34, %v441_v15  ;;  %v452_v20 = vadd.f32 %v654_v17, %v622_v16  ;;  %v250_v21 = vpop.f32.mrf.mxu0 }
  0xf9   :  { %v443_v22 = vpop.f32.mrf.mxu1 }
  0xfa   :  { %520 = vst [vmem:[%s891_s5 + $0x50] sm:$0xff] %v504_v18  ;;  %v502_v23 = vmax.f32 %v486_v19, 0.0  ;;  %v489_v24 = vadd.f32 %v820_v34, %v452_v20  ;;  %v444_v25 = vadd.f32 %v443_v22, %v250_v21  ;;  %v625_v26 = vpop.f32.mrf.mxu0 }
  0xfb   :  { %v657_v27 = vpop.f32.mrf.mxu1 }
  0xfc   :  { %518 = vst [vmem:[%s891_s5 + $0x40] sm:$0xff] %v502_v23  ;;  %v505_v28 = vmax.f32 %v489_v24, 0.0  ;;  %v487_v29 = vadd.f32 %v820_v34, %v444_v25  ;;  %v465_v30 = vadd.f32 %v657_v27, %v625_v26  ;;  %v263_v31 = vpop.f32.mrf.mxu0 }
  0xfd   :  { %v456_v32 = vpop.f32.mrf.mxu1 }
  0xfe   :  { %521 = vst [vmem:[%s891_s5 + $0x58] sm:$0xff] %v505_v28  ;;  %v503_v33 = vmax.f32 %v487_v29, 0.0  ;;  %v492_v35 = vadd.f32 %v820_v34, %v465_v30  ;;  %v457_v36 = vadd.f32 %v456_v32, %v263_v31  ;;  %v626_v37 = vpop.f32.mrf.mxu0 }
  0xff   :  { %v658_v38 = vpop.f32.mrf.mxu1 }
 0x100   :  { %519 = vst [vmem:[%s891_s5 + $0x48] sm:$0xff] %v503_v33  ;;  %v508_v39 = vmax.f32 %v492_v35, 0.0  ;;  %v490_v40 = vadd.f32 %v820_v34, %v457_v36  ;;  %v468_v41 = vadd.f32 %v658_v38, %v626_v37  ;;  %v266_v42 = vpop.f32.mrf.mxu0 }
 0x101   :  { %v459_v43 = vpop.f32.mrf.mxu1 }
 0x102   :  { %524 = vst [vmem:[%s891_s5 + $0x70] sm:$0xff] %v508_v39  ;;  %v506_v44 = vmax.f32 %v490_v40, 0.0  ;;  %v493_v45 = vadd.f32 %v820_v34, %v468_v41  ;;  %v460_v46 = vadd.f32 %v459_v43, %v266_v42 }
 0x104   :  { %522 = vst [vmem:[%s891_s5 + $0x60] sm:$0xff] %v506_v44  ;;  %v509_v47 = vmax.f32 %v493_v45, 0.0  ;;  %v491_v48 = vadd.f32 %v820_v34, %v460_v46 }
 0x106   :  { %525 = vst [vmem:[%s891_s5 + $0x78] sm:$0xff] %v509_v47  ;;  %v507_v49 = vmax.f32 %v491_v48, 0.0 }
 0x108   :  { %523 = vst [vmem:[%s891_s5 + $0x68] sm:$0xff] %v507_v49 }

// kernel: res_unit_forward.4
= control target key start
LH: loop header
LB: loop body
LE: loop exit
PB: predicated region body
PF: predicated region fallthrough
CT: control target
= control target key end

     0   :  { %s2950_s1 = inlined_call_operand.vmem [shape: bf16[1152,128], index: 1, kind: input, shape index: {}]   ;;  %s2951_s0 = inlined_call_operand.vmem [shape: bf16[128,1152], index: 0, kind: input, shape index: {}]   ;;  %s2952_s2 = inlined_call_operand.vmem [shape: f32[1,128], index: 2, kind: input, shape index: {}]   ;;  %s2953_s3 = inlined_call_operand.vmem [shape: bf16[128,128], index: 3, kind: output, shape index: {}]  }
   0x1   :  { %v2175_v0 = vld [vmem:[%s2950_s1 + $0x78] sm:$0xff]   ;;  %v2179_v4 = vld [vmem:[%s2950_s1 + $0x70] sm:$0xff]   ;;  %v2183_v8 = vld [vmem:[%s2950_s1 + $0x68] sm:$0xff]  }
   0x2   :  { %v2176_v1 = vld [vmem:[%s2950_s1 + $0xf8] sm:$0xff]   ;;  %1855 = vmatprep.subr.bf16.mxu0 %v2175_v0  ;;  %v2180_v5 = vld [vmem:[%s2950_s1 + $0xf0] sm:$0xff]   ;;  %v2184_v9 = vld [vmem:[%s2950_s1 + $0xe8] sm:$0xff]  }
   0x3   :  { %v2177_v2 = vld [vmem:[%s2950_s1 + $0x38] sm:$0xff]   ;;  %1919 = vmatprep.subr.bf16.mxu1 %v2176_v1  ;;  %v2181_v6 = vld [vmem:[%s2950_s1 + $0x30] sm:$0xff]   ;;  %v2185_v10 = vld [vmem:[%s2950_s1 + $0x28] sm:$0xff]  }
   0x4   :  { %v2178_v3 = vld [vmem:[%s2950_s1 + $0xb8] sm:$0xff]   ;;  %1856 = vmatpush3.bf16.msra.mxu0 %v2177_v2  ;;  %v2182_v7 = vld [vmem:[%s2950_s1 + $0xb0] sm:$0xff]   ;;  %v2186_v11 = vld [vmem:[%s2950_s1 + $0xa8] sm:$0xff]  }
   0x5   :  { %1920 = vmatpush3.bf16.msra.mxu1 %v2178_v3  ;;  %1857 = vmatprep.subr.bf16.mxu0 %v2179_v4  ;;  %v2187_v12 = vld [vmem:[%s2950_s1 + $0x60] sm:$0xff]   ;;  %v2191_v16 = vld [vmem:[%s2950_s1 + $0x58] sm:$0xff]   ;;  %v2195_v20 = vld [vmem:[%s2950_s1 + $0x50] sm:$0xff]  }
   0x6   :  { %1921 = vmatprep.subr.bf16.mxu1 %v2180_v5  ;;  %v2188_v13 = vld [vmem:[%s2950_s1 + $0xe0] sm:$0xff]   ;;  %v2192_v17 = vld [vmem:[%s2950_s1 + $0xd8] sm:$0xff]   ;;  %v2196_v21 = vld [vmem:[%s2950_s1 + $0xd0] sm:$0xff]  }
   0x7   :  { %v2189_v14 = vld [vmem:[%s2950_s1 + $0x20] sm:$0xff]   ;;  %v2193_v18 = vld [vmem:[%s2950_s1 + $0x18] sm:$0xff]   ;;  %v2197_v22 = vld [vmem:[%s2950_s1 + $0x10] sm:$0xff]  }
   0x8   :  { %1858 = vmatpush3.bf16.msra.mxu0 %v2181_v6  ;;  %v2190_v15 = vld [vmem:[%s2950_s1 + $0xa0] sm:$0xff]   ;;  %v2194_v19 = vld [vmem:[%s2950_s1 + $0x98] sm:$0xff]   ;;  %v2198_v23 = vld [vmem:[%s2950_s1 + $0x90] sm:$0xff]  }
   0x9   :  { %1922 = vmatpush3.bf16.msra.mxu1 %v2182_v7  ;;  %1859 = vmatprep.subr.bf16.mxu0 %v2183_v8  ;;  %v2199_v24 = vld [vmem:[%s2950_s1 + $0x48] sm:$0xff]   ;;  %v2203_v28 = vld [vmem:[%s2950_s1 + $0x40] sm:$0xff]   ;;  %v2213_v36 = vld [vmem:[%s2950_s1 + $0x178] sm:$0xff]  }
   0xa   :  { %1923 = vmatprep.subr.bf16.mxu1 %v2184_v9  ;;  %v2200_v25 = vld [vmem:[%s2950_s1 + $0xc8] sm:$0xff]   ;;  %v2204_v29 = vld [vmem:[%s2950_s1 + $0xc0] sm:$0xff]   ;;  %v2214_v37 = vld [vmem:[%s2950_s1 + $0x1f8] sm:$0xff]  }
   0xb   :  { %v2201_v26 = vld [vmem:[%s2950_s1 + $0x8] sm:$0xff]   ;;  %v2205_v30 = vld [vmem:[%s2950_s1] sm:$0xff]   ;;  %v2215_v38 = vld [vmem:[%s2950_s1 + $0x138] sm:$0xff]  }
   0xc   :  { %1860 = vmatpush3.bf16.msra.mxu0 %v2185_v10  ;;  %v2202_v27 = vld [vmem:[%s2950_s1 + $0x88] sm:$0xff]   ;;  %v2206_v31 = vld [vmem:[%s2950_s1 + $0x80] sm:$0xff]   ;;  %v2216_v39 = vld [vmem:[%s2950_s1 + $0x1b8] sm:$0xff]  }
   0xd   :  { %1924 = vmatpush3.bf16.msra.mxu1 %v2186_v11  ;;  %1861 = vmatprep.subr.bf16.mxu0 %v2187_v12  ;;  %v2207_v32 = vld [vmem:[%s2951_s0] ss:$36 sps:$4 sm:$0xff]   ;;  %v2210_v34 = vld [vmem:[%s2951_s0 + $0x8] ss:$36 sps:$4 sm:$0xff]   ;;  %v2219_v41 = vld [vmem:[%s2951_s0 + $0x54] ss:$36 sps:$4 sm:$0xff]  }
   0xe   :  { %1925 = vmatprep.subr.bf16.mxu1 %v2188_v13  ;;  %v2209_v33 = vld [vmem:[%s2951_s0 + $0x4] ss:$36 sps:$4 sm:$0xff]   ;;  %v2212_v35 = vld [vmem:[%s2951_s0 + $0xc] ss:$36 sps:$4 sm:$0xff]   ;;  %v2227_v48 = vld [vmem:[%s2951_s0 + $0x94] ss:$36 sps:$4 sm:$0xff]  }
   0xf   :  { %1078 = vmatprep.mubr.bf16.mxu0 %v2209_v33  ;;  %1175 = vmatprep.mubr.bf16.mxu1 %v2212_v35  ;;  %v2217_v40 = vld [vmem:[%s2951_s0 + $0x4c] ss:$36 sps:$4 sm:$0xff]   ;;  %v2229_v49 = vld [vmem:[%s2951_s0 + $0x9c] ss:$36 sps:$4 sm:$0xff]   ;;  %v2239_v57 = vld [vmem:[%s2951_s0 + $0xe4] ss:$36 sps:$4 sm:$0xff]  }
  0x10   :  { %1862 = vmatpush3.bf16.msra.mxu0 %v2189_v14  ;;  %v2221_v42 = vld [vmem:[%s2951_s0 + $0x48] ss:$36 sps:$4 sm:$0xff]   ;;  %v2222_v43 = vld [vmem:[%s2951_s0 + $0x50] ss:$36 sps:$4 sm:$0xff]   ;;  %v2232_v51 = vld [vmem:[%s2951_s0 + $0x98] ss:$36 sps:$4 sm:$0xff]  }
  0x11   :  { %1926 = vmatpush3.bf16.msra.mxu1 %v2190_v15  ;;  %1863 = vmatprep.subr.bf16.mxu0 %v2191_v16  ;;  %v2223_v44 = vld [vmem:[%s2950_s1 + $0x170] sm:$0xff]   ;;  %v2233_v52 = vld [vmem:[%s2950_s1 + $0x168] sm:$0xff]   ;;  %v2237_v56 = vld [vmem:[%s2951_s0 + $0xdc] ss:$36 sps:$4 sm:$0xff]  }
  0x12   :  { %1927 = vmatprep.subr.bf16.mxu1 %v2192_v17  ;;  %v2224_v45 = vld [vmem:[%s2950_s1 + $0x1f0] sm:$0xff]   ;;  %v2234_v53 = vld [vmem:[%s2950_s1 + $0x1e8] sm:$0xff]   ;;  %v2241_v58 = vld [vmem:[%s2951_s0 + $0xd8] ss:$36 sps:$4 sm:$0xff]  }
  0x13   :  { %v2225_v46 = vld [vmem:[%s2950_s1 + $0x130] sm:$0xff]   ;;  %v2235_v54 = vld [vmem:[%s2950_s1 + $0x128] sm:$0xff]   ;;  %v2242_v59 = vld [vmem:[%s2951_s0 + $0xe0] ss:$36 sps:$4 sm:$0xff]  }
  0x14   :  { %1864 = vmatpush3.bf16.msra.mxu0 %v2193_v18  ;;  %v2226_v47 = vld [vmem:[%s2950_s1 + $0x1b0] sm:$0xff]   ;;  %v2236_v55 = vld [vmem:[%s2950_s1 + $0x1a8] sm:$0xff]   ;;  %v2243_v60 = vld [vmem:[%s2950_s1 + $0x160] sm:$0xff]  }
  0x15   :  { %1928 = vmatpush3.bf16.msra.mxu1 %v2194_v19  ;;  %1865 = vmatprep.subr.bf16.mxu0 %v2195_v20  ;;  %v2231_v50 = vld [vmem:[%s2951_s0 + $0x90] ss:$36 sps:$4 sm:$0xff]   ;;  %v2244_v61 = vld [vmem:[%s2950_s1 + $0x1e0] sm:$0xff]   ;;  %v2253_v3 = vld [vmem:[%s2950_s1 + $0x158] sm:$0xff]  }
  0x16   :  { %1929 = vmatprep.subr.bf16.mxu1 %v2196_v21  ;;  %v2245_v62 = vld [vmem:[%s2950_s1 + $0x120] sm:$0xff]   ;;  %v2249_v1 = vld [vmem:[%s2951_s0 + $0x12c] ss:$36 sps:$4 sm:$0xff]   ;;  %v2254_v5 = vld [vmem:[%s2950_s1 + $0x1d8] sm:$0xff]  }
  0x17   :  { %v2246_v63 = vld [vmem:[%s2950_s1 + $0x1a0] sm:$0xff]   ;;  %v2252_v4 = vld [vmem:[%s2951_s0 + $0x128] ss:$36 sps:$4 sm:$0xff]   ;;  %v2255_v6 = vld [vmem:[%s2950_s1 + $0x118] sm:$0xff]  }
  0x18   :  { %1866 = vmatpush3.bf16.msra.mxu0 %v2197_v22  ;;  %v2247_v0 = vld [vmem:[%s2951_s0 + $0x124] ss:$36 sps:$4 sm:$0xff]   ;;  %v2256_v7 = vld [vmem:[%s2950_s1 + $0x198] sm:$0xff]   ;;  %v2257_v8 = vld [vmem:[%s2951_s0 + $0x16c] ss:$36 sps:$4 sm:$0xff]  }
  0x19   :  { %1930 = vmatpush3.bf16.msra.mxu1 %v2198_v23  ;;  %1867 = vmatprep.subr.bf16.mxu0 %v2199_v24  ;;  %v2251_v2 = vld [vmem:[%s2951_s0 + $0x120] ss:$36 sps:$4 sm:$0xff]   ;;  %v2259_v9 = vld [vmem:[%s2951_s0 + $0x174] ss:$36 sps:$4 sm:$0xff]   ;;  %v2261_v12 = vld [vmem:[%s2951_s0 + $0x168] ss:$36 sps:$4 sm:$0xff]  }
  0x1a   :  { %1931 = vmatprep.subr.bf16.mxu1 %v2200_v25  ;;  %v2263_v10 = vld [vmem:[%s2950_s1 + $0x150] sm:$0xff]   ;;  %v2269_v17 = vld [vmem:[%s2951_s0 + $0x1bc] ss:$36 sps:$4 sm:$0xff]   ;;  %v2273_v18 = vld [vmem:[%s2950_s1 + $0x148] sm:$0xff]  }
  0x1b   :  { %v2264_v11 = vld [vmem:[%s2950_s1 + $0x1d0] sm:$0xff]   ;;  %v2274_v19 = vld [vmem:[%s2950_s1 + $0x1c8] sm:$0xff]   ;;  %v2272_v23 = vld [vmem:[%s2951_s0 + $0x1b8] ss:$36 sps:$4 sm:$0xff]  }
  0x1c   :  { %1868 = vmatpush3.bf16.msra.mxu0 %v2201_v26  ;;  %v2265_v13 = vld [vmem:[%s2950_s1 + $0x110] sm:$0xff]   ;;  %v2275_v20 = vld [vmem:[%s2950_s1 + $0x108] sm:$0xff]   ;;  %v2277_v24 = vld [vmem:[%s2951_s0 + $0x1fc] ss:$36 sps:$4 sm:$0xff]  }
  0x1d   :  { %1932 = vmatpush3.bf16.msra.mxu1 %v2202_v27  ;;  %1869 = vmatprep.subr.bf16.mxu0 %v2203_v28  ;;  %v2266_v14 = vld [vmem:[%s2950_s1 + $0x190] sm:$0xff]   ;;  %v2276_v21 = vld [vmem:[%s2950_s1 + $0x188] sm:$0xff]   ;;  %v2283_v26 = vld [vmem:[%s2950_s1 + $0x140] sm:$0xff]  }
  0x1e   :  { %1933 = vmatprep.subr.bf16.mxu1 %v2204_v29  ;;  %v2262_v15 = vld [vmem:[%s2951_s0 + $0x170] ss:$36 sps:$4 sm:$0xff]   ;;  %v2279_v25 = vld [vmem:[%s2951_s0 + $0x204] ss:$36 sps:$4 sm:$0xff]  }
  0x1f   :  { %v2267_v16 = vld [vmem:[%s2951_s0 + $0x1b4] ss:$36 sps:$4 sm:$0xff]   ;;  %v2284_v27 = vld [vmem:[%s2950_s1 + $0x1c0] sm:$0xff]  }
  0x20   :  { %1870 = vmatpush3.bf16.msra.mxu0 %v2205_v30  ;;  %v2271_v22 = vld [vmem:[%s2951_s0 + $0x1b0] ss:$36 sps:$4 sm:$0xff]   ;;  %v2285_v28 = vld [vmem:[%s2950_s1 + $0x100] sm:$0xff]   ;;  %v2281_v30 = vld [vmem:[%s2951_s0 + $0x1f8] ss:$36 sps:$4 sm:$0xff]  }
  0x21   :  { %1934 = vmatpush3.bf16.msra.mxu1 %v2206_v31  ;;  %1983 = vmatprep.subr.bf16.mxu0 %v2213_v36  ;;  %v2286_v29 = vld [vmem:[%s2950_s1 + $0x180] sm:$0xff]   ;;  %v2289_v33 = vld [vmem:[%s2951_s0 + $0x14] ss:$36 sps:$4 sm:$0xff]  }
  0x22   :  { %2047 = vmatprep.subr.bf16.mxu1 %v2214_v37  ;;  %v2282_v31 = vld [vmem:[%s2951_s0 + $0x200] ss:$36 sps:$4 sm:$0xff]   ;;  %v2287_v35 = vld [vmem:[%s2951_s0 + $0x10] ss:$36 sps:$4 sm:$0xff]   ;;  %v2290_v36 = vld [vmem:[%s2951_s0 + $0x18] ss:$36 sps:$4 sm:$0xff]  }
  0x23   :  { %1079 = vmatmul.mubr.bf16.vlgmr.msra.gmra.mxu0 %v2207_v32  ;;  %v2293_v32 = vld [vmem:[%s2950_s1 + $0x238] sm:$0xff]  }
  0x24   :  { %1176 = vmatmul.mubr.bf16.vlgmr.msra.gmra.mxu1 %v2210_v34  ;;  %1984 = vmatpush3.bf16.msra.mxu0 %v2215_v38  ;;  %v2292_v34 = vld [vmem:[%s2951_s0 + $0x1c] ss:$36 sps:$4 sm:$0xff]   ;;  %v2296_v38 = vld [vmem:[%s2951_s0 + $0x64] ss:$36 sps:$4 sm:$0xff]  }
  0x25   :  { %2048 = vmatpush3.bf16.msra.mxu1 %v2216_v39  ;;  %1086 = vmatprep.mubr.bf16.mxu0 %v2217_v40  ;;  %v2294_v37 = vld [vmem:[%s2951_s0 + $0x5c] ss:$36 sps:$4 sm:$0xff]   ;;  %v2300_v39 = vld [vmem:[%s2950_s1 + $0x230] sm:$0xff]   ;;  %v2307_v40 = vld [vmem:[%s2950_s1 + $0x228] sm:$0xff]  }
  0x26   :  { %1183 = vmatprep.mubr.bf16.mxu1 %v2219_v41  ;;  %1985 = vmatprep.subr.bf16.mxu0 %v2223_v44  ;;  %v2298_v41 = vld [vmem:[%s2951_s0 + $0x58] ss:$36 sps:$4 sm:$0xff]   ;;  %v2303_v44 = vld [vmem:[%s2951_s0 + $0xac] ss:$36 sps:$4 sm:$0xff]  }
  0x27   :  { %2049 = vmatprep.subr.bf16.mxu1 %v2224_v45  ;;  %v2314_v45 = vld [vmem:[%s2950_s1 + $0x220] sm:$0xff]  }
  0x28   :  { %1986 = vmatpush3.bf16.msra.mxu0 %v2225_v46  ;;  %v2321_v46 = vld [vmem:[%s2950_s1 + $0x218] sm:$0xff]  }
  0x29   :  { %2050 = vmatpush3.bf16.msra.mxu1 %v2226_v47  ;;  %1987 = vmatprep.subr.bf16.mxu0 %v2233_v52  ;;  %v2305_v47 = vld [vmem:[%s2951_s0 + $0xa0] ss:$36 sps:$4 sm:$0xff]   ;;  %v2312_v52 = vld [vmem:[%s2951_s0 + $0xe8] ss:$36 sps:$4 sm:$0xff]  }
  0x2a   :  { %2051 = vmatprep.subr.bf16.mxu1 %v2234_v53  ;;  %v2335_v53 = vld [vmem:[%s2950_s1 + $0x208] sm:$0xff]  }
  0x2b   :  { %1087 = vmatmul.mubr.bf16.gmra.mxu0 %v2221_v42  ;;  %v2299_v42 = vld [vmem:[%s2951_s0 + $0x60] ss:$36 sps:$4 sm:$0xff]  }
  0x2c   :  { %1184 = vmatmul.mubr.bf16.gmra.mxu1 %v2222_v43  ;;  %1094 = vmatprep.mubr.bf16.mxu0 %v2227_v48  ;;  %v2301_v43 = vld [vmem:[%s2951_s0 + $0xa4] ss:$36 sps:$4 sm:$0xff]  }
  0x2d   :  { %1191 = vmatprep.mubr.bf16.mxu1 %v2229_v49  ;;  %1988 = vmatpush3.bf16.msra.mxu0 %v2235_v54  ;;  %v2306_v48 = vld [vmem:[%s2951_s0 + $0xa8] ss:$36 sps:$4 sm:$0xff]   ;;  %v2313_v54 = vld [vmem:[%s2951_s0 + $0xf0] ss:$36 sps:$4 sm:$0xff]  }
  0x2e   :  { %2052 = vmatpush3.bf16.msra.mxu1 %v2236_v55  ;;  %1989 = vmatprep.subr.bf16.mxu0 %v2243_v60  ;;  %v2308_v49 = vld [vmem:[%s2951_s0 + $0xec] ss:$36 sps:$4 sm:$0xff]   ;;  %v2315_v55 = vld [vmem:[%s2951_s0 + $0x134] ss:$36 sps:$4 sm:$0xff]   ;;  %v2322_v60 = vld [vmem:[%s2951_s0 + $0x17c] ss:$36 sps:$4 sm:$0xff]  }
  0x2f   :  { %2053 = vmatprep.subr.bf16.mxu1 %v2244_v61  ;;  %v2324_v61 = vld [vmem:[%s2951_s0 + $0x184] ss:$36 sps:$4 sm:$0xff]  }
  0x31   :  { %1990 = vmatpush3.bf16.msra.mxu0 %v2245_v62  ;;  %v2326_v62 = vld [vmem:[%s2951_s0 + $0x178] ss:$36 sps:$4 sm:$0xff]  }
  0x32   :  { %2054 = vmatpush3.bf16.msra.mxu1 %v2246_v63  ;;  %1991 = vmatprep.subr.bf16.mxu0 %v2253_v3  ;;  %v2327_v63 = vld [vmem:[%s2951_s0 + $0x180] ss:$36 sps:$4 sm:$0xff]   ;;  %v2334_v3 = vld [vmem:[%s2951_s0 + $0x1c8] ss:$36 sps:$4 sm:$0xff]  }
  0x33   :  { %1095 = vmatmul.mubr.bf16.gmra.mxu0 %v2231_v50  ;;  %2055 = vmatprep.subr.bf16.mxu1 %v2254_v5  ;;  %v2310_v50 = vld [vmem:[%s2951_s0 + $0xf4] ss:$36 sps:$4 sm:$0xff]  }
  0x34   :  { %1192 = vmatmul.mubr.bf16.gmra.mxu1 %v2232_v51  ;;  %1102 = vmatprep.mubr.bf16.mxu0 %v2237_v56  ;;  %v2328_v51 = vld [vmem:[%s2950_s1 + $0x210] sm:$0xff]   ;;  %v2317_v56 = vld [vmem:[%s2951_s0 + $0x13c] ss:$36 sps:$4 sm:$0xff]  }
  0x35   :  { %1199 = vmatprep.mubr.bf16.mxu1 %v2239_v57  ;;  %1992 = vmatpush3.bf16.msra.mxu0 %v2255_v6  ;;  %v2342_v57 = vld [vmem:[%s2950_s1 + $0x200] sm:$0xff]   ;;  %v2338_v5 = vld [vmem:[%s2951_s0 + $0x214] ss:$36 sps:$4 sm:$0xff]   ;;  %v2340_v6 = vld [vmem:[%s2951_s0 + $0x208] ss:$36 sps:$4 sm:$0xff]  }
  0x36   :  { %2056 = vmatpush3.bf16.msra.mxu1 %v2256_v7  ;;  %1993 = vmatprep.subr.bf16.mxu0 %v2263_v10  ;;  %v2341_v7 = vld [vmem:[%s2951_s0 + $0x210] ss:$36 sps:$4 sm:$0xff]   ;;  %v2345_v10 = vld [vmem:[%s2951_s0 + $0x68] ss:$36 sps:$4 sm:$0xff]  }
  0x37   :  { %2057 = vmatprep.subr.bf16.mxu1 %v2264_v11  ;;  %v2346_v11 = vld [vmem:[%s2951_s0 + $0x188] ss:$36 sps:$4 sm:$0xff]  }
  0x39   :  { %1994 = vmatpush3.bf16.msra.mxu0 %v2265_v13  ;;  %v2348_v13 = vld [vmem:[%s2951_s0 + $0x1d0] ss:$36 sps:$4 sm:$0xff]  }
  0x3a   :  { %2058 = vmatpush3.bf16.msra.mxu1 %v2266_v14  ;;  %1995 = vmatprep.subr.bf16.mxu0 %v2273_v18  ;;  %v2349_v14 = vld [vmem:[%s2951_s0 + $0xf8] ss:$36 sps:$4 sm:$0xff]   ;;  %v2806_v18 = vld [vmem:[%s2952_s2] ss:$0 sm:$0xff] }
  0x3b   :  { %1103 = vmatmul.mubr.bf16.gmra.mxu0 %v2241_v58  ;;  %2059 = vmatprep.subr.bf16.mxu1 %v2274_v19  ;;  %v2319_v58 = vld [vmem:[%s2951_s0 + $0x130] ss:$36 sps:$4 sm:$0xff]  }
  0x3c   :  { %1200 = vmatmul.mubr.bf16.gmra.mxu1 %v2242_v59  ;;  %1110 = vmatprep.mubr.bf16.mxu0 %v2247_v0  ;;  %v2320_v59 = vld [vmem:[%s2951_s0 + $0x138] ss:$36 sps:$4 sm:$0xff]   ;;  %v2329_v0 = vld [vmem:[%s2951_s0 + $0x1c4] ss:$36 sps:$4 sm:$0xff]  }
  0x3d   :  { %1207 = vmatprep.mubr.bf16.mxu1 %v2249_v1  ;;  %1996 = vmatpush3.bf16.msra.mxu0 %v2275_v20  ;;  %v2331_v1 = vld [vmem:[%s2951_s0 + $0x1cc] ss:$36 sps:$4 sm:$0xff]  }
  0x3e   :  { %2060 = vmatpush3.bf16.msra.mxu1 %v2276_v21  ;;  %1997 = vmatprep.subr.bf16.mxu0 %v2283_v26 }
  0x3f   :  { %2061 = vmatprep.subr.bf16.mxu1 %v2284_v27 }
  0x41   :  { %1998 = vmatpush3.bf16.msra.mxu0 %v2285_v28 }
  0x42   :  { %2062 = vmatpush3.bf16.msra.mxu1 %v2286_v29  ;;  %2127 = vmatprep.subr.bf16.mxu0 %v2293_v32 }
  0x43   :  { %1111 = vmatmul.mubr.bf16.gmra.mxu0 %v2251_v2  ;;  %2159 = vmatprep.subr.bf16.mxu1 %v2293_v32  ;;  %v2333_v2 = vld [vmem:[%s2951_s0 + $0x1c0] ss:$36 sps:$4 sm:$0xff]  }
  0x44   :  { %1208 = vmatmul.mubr.bf16.gmra.mxu1 %v2252_v4  ;;  %1118 = vmatprep.mubr.bf16.mxu0 %v2257_v8  ;;  %v2336_v4 = vld [vmem:[%s2951_s0 + $0x20c] ss:$36 sps:$4 sm:$0xff]   ;;  %v2343_v8 = vld [vmem:[%s2951_s0 + $0x20] ss:$36 sps:$4 sm:$0xff]  }
  0x45   :  { %1215 = vmatprep.mubr.bf16.mxu1 %v2259_v9  ;;  %v2344_v9 = vld [vmem:[%s2951_s0 + $0x140] ss:$36 sps:$4 sm:$0xff]  }
  0x4b   :  { %1119 = vmatmul.mubr.bf16.gmra.mxu0 %v2261_v12  ;;  %v2347_v12 = vld [vmem:[%s2951_s0 + $0xb0] ss:$36 sps:$4 sm:$0xff]  }
  0x4c   :  { %1216 = vmatmul.mubr.bf16.gmra.mxu1 %v2262_v15  ;;  %1126 = vmatprep.mubr.bf16.mxu0 %v2267_v16  ;;  %v2350_v15 = vld [vmem:[%s2951_s0 + $0x218] ss:$36 sps:$4 sm:$0xff]  }
  0x4d   :  { %1223 = vmatprep.mubr.bf16.mxu1 %v2269_v17 }
  0x53   :  { %1127 = vmatmul.mubr.bf16.gmra.mxu0 %v2271_v22 }
  0x54   :  { %1224 = vmatmul.mubr.bf16.gmra.mxu1 %v2272_v23  ;;  %1134 = vmatprep.mubr.bf16.mxu0 %v2277_v24 }
  0x55   :  { %1231 = vmatprep.mubr.bf16.mxu1 %v2279_v25 }
  0x5b   :  { %1135 = vmatmul.mubr.bf16.gmra.mxu0 %v2281_v30 }
  0x5c   :  { %1232 = vmatmul.mubr.bf16.gmra.mxu1 %v2282_v31  ;;  %1272 = vmatprep.mubr.bf16.mxu0 %v2289_v33 }
  0x5d   :  { %1369 = vmatprep.mubr.bf16.mxu1 %v2292_v34 }
  0x63   :  { %1273 = vmatmul.mubr.bf16.vlgmr.msra.gmra.mxu0 %v2287_v35 }
  0x64   :  { %1370 = vmatmul.mubr.bf16.vlgmr.msra.gmra.mxu1 %v2290_v36  ;;  %2128 = vmatpush3.bf16.msra.mxu0 %v2293_v32 }
  0x65   :  { %2167 = vmatpush3.bf16.msra.mxu1 %v2293_v32  ;;  %1280 = vmatprep.mubr.bf16.mxu0 %v2294_v37 }
  0x66   :  { %1377 = vmatprep.mubr.bf16.mxu1 %v2296_v38  ;;  %2129 = vmatprep.subr.bf16.mxu0 %v2300_v39 }
  0x67   :  { %2160 = vmatprep.subr.bf16.mxu1 %v2300_v39 }
  0x68   :  { %2130 = vmatpush3.bf16.msra.mxu0 %v2300_v39 }
  0x69   :  { %2168 = vmatpush3.bf16.msra.mxu1 %v2300_v39  ;;  %2131 = vmatprep.subr.bf16.mxu0 %v2307_v40 }
  0x6a   :  { %2161 = vmatprep.subr.bf16.mxu1 %v2307_v40 }
  0x6b   :  { %1281 = vmatmul.mubr.bf16.gmra.mxu0 %v2298_v41 }
  0x6c   :  { %1378 = vmatmul.mubr.bf16.gmra.mxu1 %v2299_v42  ;;  %1288 = vmatprep.mubr.bf16.mxu0 %v2301_v43 }
  0x6d   :  { %1385 = vmatprep.mubr.bf16.mxu1 %v2303_v44  ;;  %2132 = vmatpush3.bf16.msra.mxu0 %v2307_v40 }
  0x6e   :  { %2169 = vmatpush3.bf16.msra.mxu1 %v2307_v40  ;;  %2133 = vmatprep.subr.bf16.mxu0 %v2314_v45 }
  0x6f   :  { %2162 = vmatprep.subr.bf16.mxu1 %v2314_v45 }
  0x71   :  { %2134 = vmatpush3.bf16.msra.mxu0 %v2314_v45 }
  0x72   :  { %2170 = vmatpush3.bf16.msra.mxu1 %v2314_v45  ;;  %2135 = vmatprep.subr.bf16.mxu0 %v2321_v46 }
  0x73   :  { %1289 = vmatmul.mubr.bf16.gmra.mxu0 %v2305_v47  ;;  %2163 = vmatprep.subr.bf16.mxu1 %v2321_v46 }
  0x74   :  { %1386 = vmatmul.mubr.bf16.gmra.mxu1 %v2306_v48  ;;  %1296 = vmatprep.mubr.bf16.mxu0 %v2308_v49 }
  0x75   :  { %1393 = vmatprep.mubr.bf16.mxu1 %v2310_v50  ;;  %2136 = vmatpush3.bf16.msra.mxu0 %v2321_v46 }
  0x76   :  { %2171 = vmatpush3.bf16.msra.mxu1 %v2321_v46  ;;  %2137 = vmatprep.subr.bf16.mxu0 %v2328_v51 }
  0x77   :  { %2164 = vmatprep.subr.bf16.mxu1 %v2328_v51 }
  0x79   :  { %2138 = vmatpush3.bf16.msra.mxu0 %v2328_v51 }
  0x7a   :  { %2172 = vmatpush3.bf16.msra.mxu1 %v2328_v51  ;;  %2139 = vmatprep.subr.bf16.mxu0 %v2335_v53 }
  0x7b   :  { %1297 = vmatmul.mubr.bf16.gmra.mxu0 %v2312_v52  ;;  %2165 = vmatprep.subr.bf16.mxu1 %v2335_v53 }
  0x7c   :  { %1394 = vmatmul.mubr.bf16.gmra.mxu1 %v2313_v54  ;;  %1304 = vmatprep.mubr.bf16.mxu0 %v2315_v55 }
  0x7d   :  { %1401 = vmatprep.mubr.bf16.mxu1 %v2317_v56  ;;  %2140 = vmatpush3.bf16.msra.mxu0 %v2335_v53 }
  0x7e   :  { %2173 = vmatpush3.bf16.msra.mxu1 %v2335_v53  ;;  %2141 = vmatprep.subr.bf16.mxu0 %v2342_v57 }
  0x7f   :  { %2166 = vmatprep.subr.bf16.mxu1 %v2342_v57 }
  0x81   :  { %2142 = vmatpush3.bf16.msra.mxu0 %v2342_v57 }
  0x82   :  { %2174 = vmatpush3.bf16.msra.mxu1 %v2342_v57 }
  0x83   :  { %1305 = vmatmul.mubr.bf16.gmra.mxu0 %v2319_v58 }
  0x84   :  { %1402 = vmatmul.mubr.bf16.gmra.mxu1 %v2320_v59  ;;  %1312 = vmatprep.mubr.bf16.mxu0 %v2322_v60 }
  0x85   :  { %1409 = vmatprep.mubr.bf16.mxu1 %v2324_v61 }
  0x8b   :  { %1313 = vmatmul.mubr.bf16.gmra.mxu0 %v2326_v62 }
  0x8c   :  { %1410 = vmatmul.mubr.bf16.gmra.mxu1 %v2327_v63  ;;  %1320 = vmatprep.mubr.bf16.mxu0 %v2329_v0 }
  0x8d   :  { %1417 = vmatprep.mubr.bf16.mxu1 %v2331_v1 }
  0x93   :  { %1321 = vmatmul.mubr.bf16.gmra.mxu0 %v2333_v2 }
  0x94   :  { %1418 = vmatmul.mubr.bf16.gmra.mxu1 %v2334_v3  ;;  %1328 = vmatprep.mubr.bf16.mxu0 %v2336_v4 }
  0x95   :  { %1425 = vmatprep.mubr.bf16.mxu1 %v2338_v5 }
  0x9b   :  { %1329 = vmatmul.mubr.bf16.gmra.mxu0 %v2340_v6 }
  0x9c   :  { %1426 = vmatmul.mubr.bf16.gmra.mxu1 %v2341_v7  ;;  %2143 = vmatprep.mubr.bf16.mxu0 %v2343_v8 }
  0x9d   :  { %2151 = vmatprep.mubr.bf16.mxu1 %v2344_v9 }
  0xa3   :  { %2144 = vmatmul.mubr.bf16.vlgmr.msra.gmra.mxu0 %v2345_v10 }
  0xa4   :  { %2152 = vmatmul.mubr.bf16.vlgmr.msra.gmra.mxu1 %v2346_v11  ;;  %2147 = vmatprep.mubr.bf16.mxu0 %v2347_v12 }
  0xa5   :  { %2155 = vmatprep.mubr.bf16.mxu1 %v2348_v13 }
  0xab   :  { %2148 = vmatmul.mubr.bf16.gmra.mxu0 %v2349_v14 }
  0xac   :  { %2156 = vmatmul.mubr.bf16.gmra.mxu1 %v2350_v15 }
  0xe3   :  { %v1871_v16 = vpop.f32.mrf.mxu0 }
  0xe4   :  { %v1935_v17 = vpop.f32.mrf.mxu1 }
  0xe5   :  { %v1872_v19 = vpop.f32.mrf.mxu0 }
  0xe6   :  { %v1873_v20 = vadd.f32 %v1872_v19, %v1871_v16  ;;  %v1936_v21 = vpop.f32.mrf.mxu1 }
  0xe7   :  { %v1937_v22 = vadd.f32 %v1936_v21, %v1935_v17  ;;  %v1874_v23 = vpop.f32.mrf.mxu0 }
  0xe8   :  { %v1081_v24 = vadd.f32 %v1873_v20, %v2806_v18  ;;  %v1938_v25 = vpop.f32.mrf.mxu1 }
  0xe9   :  { %v1875_v26 = vpop.f32.mrf.mxu0 }
  0xea   :  { %v2809_v27 = vadd.f32 %v1937_v22, %v1081_v24  ;;  %v1876_v28 = vadd.f32 %v1875_v26, %v1874_v23  ;;  %v1939_v29 = vpop.f32.mrf.mxu1 }
  0xeb   :  { %v1940_v30 = vadd.f32 %v1939_v29, %v1938_v25  ;;  %v1877_v31 = vpop.f32.mrf.mxu0 }
  0xec   :  { %v1084_v32 = vadd.f32 %v1876_v28, %v2806_v18  ;;  %v1941_v33 = vpop.f32.mrf.mxu1 }
  0xed   :  { %v1878_v34 = vpop.f32.mrf.mxu0 }
  0xee   :  { %v2812_v35 = vadd.f32 %v1940_v30, %v1084_v32  ;;  %v1879_v36 = vadd.f32 %v1878_v34, %v1877_v31  ;;  %v1942_v37 = vpop.f32.mrf.mxu1 }
  0xef   :  { %v1943_v38 = vadd.f32 %v1942_v37, %v1941_v33  ;;  %v1880_v39 = vpop.f32.mrf.mxu0 }
  0xf0   :  { %v1089_v40 = vadd.f32 %v1879_v36, %v2806_v18  ;;  %v1944_v41 = vpop.f32.mrf.mxu1 }
  0xf1   :  { %v1881_v42 = vpop.f32.mrf.mxu0 }
  0xf2   :  { %v2815_v43 = vadd.f32 %v1943_v38, %v1089_v40  ;;  %v1882_v44 = vadd.f32 %v1881_v42, %v1880_v39  ;;  %v1945_v45 = vpop.f32.mrf.mxu1 }
  0xf3   :  { %v1946_v46 = vadd.f32 %v1945_v45, %v1944_v41  ;;  %v1883_v47 = vpop.f32.mrf.mxu0 }
  0xf4   :  { %v1092_v48 = vadd.f32 %v1882_v44, %v2806_v18  ;;  %v1947_v49 = vpop.f32.mrf.mxu1 }
  0xf5   :  { %v1884_v50 = vpop.f32.mrf.mxu0 }
  0xf6   :  { %v2818_v51 = vadd.f32 %v1946_v46, %v1092_v48  ;;  %v1885_v52 = vadd.f32 %v1884_v50, %v1883_v47  ;;  %v1948_v53 = vpop.f32.mrf.mxu1 }
  0xf7   :  { %v1949_v54 = vadd.f32 %v1948_v53, %v1947_v49  ;;  %v1886_v55 = vpop.f32.mrf.mxu0 }
  0xf8   :  { %v1097_v56 = vadd.f32 %v1885_v52, %v2806_v18  ;;  %v1950_v57 = vpop.f32.mrf.mxu1 }
  0xf9   :  { %v1887_v58 = vpop.f32.mrf.mxu0 }
  0xfa   :  { %v2821_v59 = vadd.f32 %v1949_v54, %v1097_v56  ;;  %v1888_v60 = vadd.f32 %v1887_v58, %v1886_v55  ;;  %v1951_v61 = vpop.f32.mrf.mxu1 }
  0xfb   :  { %v1952_v62 = vadd.f32 %v1951_v61, %v1950_v57  ;;  %v1889_v63 = vpop.f32.mrf.mxu0 }
  0xfc   :  { %v1100_v0 = vadd.f32 %v1888_v60, %v2806_v18  ;;  %v1953_v1 = vpop.f32.mrf.mxu1 }
  0xfd   :  { %v1890_v2 = vpop.f32.mrf.mxu0 }
  0xfe   :  { %v2824_v3 = vadd.f32 %v1952_v62, %v1100_v0  ;;  %v1891_v4 = vadd.f32 %v1890_v2, %v1889_v63  ;;  %v1954_v5 = vpop.f32.mrf.mxu1 }
  0xff   :  { %v1955_v6 = vadd.f32 %v1954_v5, %v1953_v1  ;;  %v1892_v7 = vpop.f32.mrf.mxu0 }
 0x100   :  { %2954 = vst [vmem:[#allocation2_spill] sm:$0xff] %v2824_v3  ;;  %v1105_v8 = vadd.f32 %v1891_v4, %v2806_v18  ;;  %v1956_v9 = vpop.f32.mrf.mxu1 }
 0x101   :  { %v1893_v10 = vpop.f32.mrf.mxu0 }
 0x102   :  { %v2827_v11 = vadd.f32 %v1955_v6, %v1105_v8  ;;  %v1894_v12 = vadd.f32 %v1893_v10, %v1892_v7  ;;  %v1957_v13 = vpop.f32.mrf.mxu1 }
 0x103   :  { %v1958_v14 = vadd.f32 %v1957_v13, %v1956_v9  ;;  %v1895_v15 = vpop.f32.mrf.mxu0 }
 0x104   :  { %v1108_v16 = vadd.f32 %v1894_v12, %v2806_v18  ;;  %v1959_v17 = vpop.f32.mrf.mxu1 }
 0x105   :  { %v1896_v19 = vpop.f32.mrf.mxu0 }
 0x106   :  { %v2830_v20 = vadd.f32 %v1958_v14, %v1108_v16  ;;  %v1897_v21 = vadd.f32 %v1896_v19, %v1895_v15  ;;  %v1960_v22 = vpop.f32.mrf.mxu1 }
 0x107   :  { %v1961_v23 = vadd.f32 %v1960_v22, %v1959_v17  ;;  %v1898_v24 = vpop.f32.mrf.mxu0 }
 0x108   :  { %2955 = vst [vmem:[#allocation3_spill] sm:$0xff] %v2830_v20  ;;  %v1113_v25 = vadd.f32 %v1897_v21, %v2806_v18  ;;  %v1962_v26 = vpop.f32.mrf.mxu1 }
 0x109   :  { %v1899_v28 = vpop.f32.mrf.mxu0 }
 0x10a   :  { %v2833_v29 = vadd.f32 %v1961_v23, %v1113_v25  ;;  %v1900_v30 = vadd.f32 %v1899_v28, %v1898_v24  ;;  %v1963_v31 = vpop.f32.mrf.mxu1 }
 0x10b   :  { %v1964_v32 = vadd.f32 %v1963_v31, %v1962_v26  ;;  %v1901_v33 = vpop.f32.mrf.mxu0 }
 0x10c   :  { %v1116_v34 = vadd.f32 %v1900_v30, %v2806_v18  ;;  %v1965_v36 = vpop.f32.mrf.mxu1 }
 0x10d   :  { %v1902_v37 = vpop.f32.mrf.mxu0 }
 0x10e   :  { %v2836_v38 = vadd.f32 %v1964_v32, %v1116_v34  ;;  %v1903_v39 = vadd.f32 %v1902_v37, %v1901_v33  ;;  %v1966_v40 = vpop.f32.mrf.mxu1 }
 0x10f   :  { %v1967_v41 = vadd.f32 %v1966_v40, %v1965_v36  ;;  %v1904_v42 = vpop.f32.mrf.mxu0 }
 0x110   :  { %2956 = vst [vmem:[#allocation4_spill] sm:$0xff] %v2836_v38  ;;  %v1121_v44 = vadd.f32 %v1903_v39, %v2806_v18  ;;  %v1968_v45 = vpop.f32.mrf.mxu1 }
 0x111   :  { %v1905_v46 = vpop.f32.mrf.mxu0 }
 0x112   :  { %v2839_v47 = vadd.f32 %v1967_v41, %v1121_v44  ;;  %v1906_v48 = vadd.f32 %v1905_v46, %v1904_v42  ;;  %v1969_v49 = vpop.f32.mrf.mxu1 }
 0x113   :  { %v1970_v50 = vadd.f32 %v1969_v49, %v1968_v45  ;;  %v1907_v52 = vpop.f32.mrf.mxu0 }
 0x114   :  { %v1124_v53 = vadd.f32 %v1906_v48, %v2806_v18  ;;  %v1971_v54 = vpop.f32.mrf.mxu1 }
 0x115   :  { %v1908_v55 = vpop.f32.mrf.mxu0 }
 0x116   :  { %v2842_v56 = vadd.f32 %v1970_v50, %v1124_v53  ;;  %v1909_v57 = vadd.f32 %v1908_v55, %v1907_v52  ;;  %v1972_v58 = vpop.f32.mrf.mxu1 }
 0x117   :  { %v1973_v60 = vadd.f32 %v1972_v58, %v1971_v54  ;;  %v1910_v61 = vpop.f32.mrf.mxu0 }
 0x118   :  { %2957 = vst [vmem:[#allocation5_spill] sm:$0xff] %v2842_v56  ;;  %v1129_v62 = vadd.f32 %v1909_v57, %v2806_v18  ;;  %v1974_v63 = vpop.f32.mrf.mxu1 }
 0x119   :  { %v1911_v0 = vpop.f32.mrf.mxu0 }
 0x11a   :  { %v2845_v1 = vadd.f32 %v1973_v60, %v1129_v62  ;;  %v1912_v2 = vadd.f32 %v1911_v0, %v1910_v61  ;;  %v1975_v4 = vpop.f32.mrf.mxu1 }
 0x11b   :  { %v1976_v5 = vadd.f32 %v1975_v4, %v1974_v63  ;;  %v1913_v6 = vpop.f32.mrf.mxu0 }
 0x11c   :  { %2958 = vst [vmem:[#allocation6_spill] sm:$0xff] %v2845_v1  ;;  %v1132_v7 = vadd.f32 %v1912_v2, %v2806_v18  ;;  %v1977_v8 = vpop.f32.mrf.mxu1 }
 0x11d   :  { %v1914_v9 = vpop.f32.mrf.mxu0 }
 0x11e   :  { %v2848_v10 = vadd.f32 %v1976_v5, %v1132_v7  ;;  %v1915_v12 = vadd.f32 %v1914_v9, %v1913_v6  ;;  %v1978_v13 = vpop.f32.mrf.mxu1 }
 0x11f   :  { %v1979_v14 = vadd.f32 %v1978_v13, %v1977_v8  ;;  %v1916_v15 = vpop.f32.mrf.mxu0 }
 0x120   :  { %2959 = vst [vmem:[#allocation7_spill] sm:$0xff] %v2848_v10  ;;  %v1137_v16 = vadd.f32 %v1915_v12, %v2806_v18  ;;  %v1980_v17 = vpop.f32.mrf.mxu1 }
 0x121   :  { %v1917_v19 = vpop.f32.mrf.mxu0 }
 0x122   :  { %v2851_v21 = vadd.f32 %v1979_v14, %v1137_v16  ;;  %v1918_v22 = vadd.f32 %v1917_v19, %v1916_v15  ;;  %v1981_v23 = vpop.f32.mrf.mxu1 }
 0x123   :  { %v1982_v24 = vadd.f32 %v1981_v23, %v1980_v17  ;;  %v1999_v25 = vpop.f32.mrf.mxu0 }
 0x124   :  { %2960 = vst [vmem:[#allocation8_spill] sm:$0xff] %v2851_v21  ;;  %v1140_v26 = vadd.f32 %v1918_v22, %v2806_v18  ;;  %v2063_v28 = vpop.f32.mrf.mxu1 }
 0x125   :  { %v2000_v30 = vpop.f32.mrf.mxu0 }
 0x126   :  { %v2854_v31 = vadd.f32 %v1982_v24, %v1140_v26  ;;  %v2001_v32 = vadd.f32 %v2000_v30, %v1999_v25  ;;  %v2064_v33 = vpop.f32.mrf.mxu1 }
 0x127   :  { %v2002_v34 = vpop.f32.mrf.mxu0  ;;  %v2065_v37 = vadd.f32 %v2064_v33, %v2063_v28 }
 0x128   :  { %2961 = vst [vmem:[#allocation9_spill] sm:$0xff] %v2854_v31  ;;  %v1275_v36 = vadd.f32 %v2001_v32, %v2809_v27  ;;  %v2857_v39 = vpop.f32.mrf.mxu1 }
 0x129   :  { %v2003_v40 = vpop.f32.mrf.mxu0 }
 0x12a   :  { %v2859_v41 = vpop.f32.mrf.mxu1  ;;  %v2861_v42 = vadd.f32 %v2065_v37, %v1275_v36  ;;  %v2004_v10 = vadd.f32 %v2003_v40, %v2002_v34 }
 0x12b   :  { %v2005_v44 = vpop.f32.mrf.mxu0 }
 0x12c   :  { %2962 = vst [vmem:[#allocation10_spill] sm:$0xff] %v2861_v42  ;;  %v2069_v45 = vpop.f32.mrf.mxu1  ;;  %v1278_v56 = vadd.f32 %v2004_v10, %v2812_v35 }
 0x12d   :  { %v2006_v18 = vpop.f32.mrf.mxu0 }
 0x12e   :  { %v2070_v46 = vpop.f32.mrf.mxu1  ;;  %v2007_v42 = vadd.f32 %v2006_v18, %v2005_v44  ;;  %v2068_v44 = vadd.f32 %v2859_v41, %v2857_v39 }
 0x12f   :  { %v2008_v48 = vpop.f32.mrf.mxu0  ;;  %v2071_v18 = vadd.f32 %v2070_v46, %v2069_v45 }
 0x130   :  { %v2072_v49 = vpop.f32.mrf.mxu1 }
 0x131   :  { %v2009_v50 = vpop.f32.mrf.mxu0 }
 0x132   :  { %v2073_v52 = vpop.f32.mrf.mxu1  ;;  %v2010_v21 = vadd.f32 %v2009_v50, %v2008_v48 }
 0x133   :  { %v2011_v53 = vpop.f32.mrf.mxu0  ;;  %v2074_v48 = vadd.f32 %v2073_v52, %v2072_v49 }
 0x134   :  { %v2075_v54 = vpop.f32.mrf.mxu1 }
 0x135   :  { %v2012_v55 = vpop.f32.mrf.mxu0 }
 0x136   :  { %v2076_v27 = vpop.f32.mrf.mxu1 }
 0x137   :  { %v2014_v57 = vpop.f32.mrf.mxu0 }
 0x138   :  { %v2863_v58 = vpop.f32.mrf.mxu1 }
 0x139   :  { %v2015_v60 = vpop.f32.mrf.mxu0 }
 0x13a   :  { %v2865_v61 = vpop.f32.mrf.mxu1  ;;  %v2016_v35 = vadd.f32 %v2015_v60, %v2014_v57 }
 0x13b   :  { %v2017_v62 = vpop.f32.mrf.mxu0  ;;  %v2899_v41 = vadd.f32 %v2865_v61, %v2863_v58 }
 0x13c   :  { %v2867_v63 = vpop.f32.mrf.mxu1 }
 0x13d   :  { %v2018_v0 = vpop.f32.mrf.mxu0 }
 0x13e   :  { %v2082_v2 = vpop.f32.mrf.mxu1  ;;  %v2019_v38 = vadd.f32 %v2018_v0, %v2017_v62 }
 0x13f   :  { %v2020_v4 = vpop.f32.mrf.mxu0  ;;  %v2083_v45 = vadd.f32 %v2082_v2, %v2867_v63 }
 0x140   :  { %v2869_v5 = vpop.f32.mrf.mxu1 }
 0x141   :  { %2963 = vst [vmem:[#allocation11_spill] sm:$0xff] %v2869_v5  ;;  %v2021_v6 = vpop.f32.mrf.mxu0 }
 0x142   :  { %v2871_v7 = vpop.f32.mrf.mxu1  ;;  %v2022_v46 = vadd.f32 %v2021_v6, %v2020_v4 }
 0x143   :  { %2964 = vst [vmem:[#allocation12_spill] sm:$0xff] %v2871_v7  ;;  %v2023_v8 = vpop.f32.mrf.mxu0  ;;  %v2013_v7 = vadd.f32 %v2012_v55, %v2011_v53  ;;  %v2077_v55 = vadd.f32 %v2076_v27, %v2075_v54  ;;  %v2971_v27 = vld [vmem:[#allocation5_spill] sm:$0xff] }
 0x144   :  { %v2873_v9 = vpop.f32.mrf.mxu1 }
 0x145   :  { %2965 = vst [vmem:[#allocation13_spill] sm:$0xff] %v2873_v9  ;;  %v2024_v12 = vpop.f32.mrf.mxu0  ;;  %v1291_v34 = vadd.f32 %v2013_v7, %v2821_v59 }
 0x146   :  { %v2088_v13 = vpop.f32.mrf.mxu1  ;;  %v2025_v50 = vadd.f32 %v2024_v12, %v2023_v8 }
 0x147   :  { %v2026_v14 = vpop.f32.mrf.mxu0  ;;  %v2895_v39 = vadd.f32 %v2077_v55, %v1291_v34  ;;  %v2981_v55 = vld [vmem:[#allocation7_spill] sm:$0xff] }
 0x148   :  { %v2090_v15 = vpop.f32.mrf.mxu1  ;;  %v1307_v49 = vadd.f32 %v2025_v50, %v2833_v29 }
 0x149   :  { %v2027_v16 = vpop.f32.mrf.mxu0 }
 0x14a   :  { %v2091_v17 = vpop.f32.mrf.mxu1  ;;  %v2028_v10 = vadd.f32 %v2027_v16, %v2026_v14 }
 0x14b   :  { %v2029_v19 = vpop.f32.mrf.mxu0  ;;  %v2092_v14 = vadd.f32 %v2091_v17, %v2090_v15 }
 0x14c   :  { %v2093_v22 = vpop.f32.mrf.mxu1  ;;  %v2972_v8 = vld [vmem:[#allocation13_spill] sm:$0xff] }
 0x14d   :  { %v2030_v23 = vpop.f32.mrf.mxu0  ;;  %v2089_v12 = vadd.f32 %v2088_v13, %v2972_v8 }
 0x14e   :  { %v2094_v24 = vpop.f32.mrf.mxu1  ;;  %v2031_v40 = vadd.f32 %v2030_v23, %v2029_v19  ;;  %v2973_v23 = vld [vmem:[#allocation3_spill] sm:$0xff] }
 0x14f   :  { %v2032_v25 = vpop.f32.mrf.mxu0  ;;  %v2095_v54 = vadd.f32 %v2094_v24, %v2093_v22  ;;  %v1404_v24 = vadd.f32 %v2089_v12, %v1307_v49 }
 0x150   :  { %v2096_v26 = vpop.f32.mrf.mxu1  ;;  %v1315_v59 = vadd.f32 %v2031_v40, %v2839_v47 }
 0x151   :  { %v2033_v28 = vpop.f32.mrf.mxu0 }
 0x152   :  { %v2097_v30 = vpop.f32.mrf.mxu1  ;;  %v2034_v62 = vadd.f32 %v2033_v28, %v2032_v25  ;;  %v1412_v29 = vadd.f32 %v2095_v54, %v1315_v59  ;;  %v1302_v25 = vadd.f32 %v2022_v46, %v2973_v23  ;;  %v2974_v28 = vld [vmem:[#allocation11_spill] sm:$0xff]  ;;  %v2982_v46 = vld [vmem:[#allocation9_spill] sm:$0xff] }
 0x153   :  { %v2035_v32 = vpop.f32.mrf.mxu0  ;;  %v2098_v63 = vadd.f32 %v2097_v30, %v2096_v26  ;;  %v2978_v30 = vld [vmem:[#allocation8_spill] sm:$0xff] }
 0x154   :  { %v2875_v33 = vpop.f32.mrf.mxu1  ;;  %v1318_v57 = vadd.f32 %v2034_v62, %v2971_v27 }
 0x155   :  { %2966 = vst [vmem:[#allocation14_spill] sm:$0xff] %v2875_v33  ;;  %v2036_v36 = vpop.f32.mrf.mxu0  ;;  %v1283_v33 = vadd.f32 %v2007_v42, %v2815_v43  ;;  %v1299_v43 = vadd.f32 %v2019_v38, %v2827_v11  ;;  %v2969_v38 = vld [vmem:[#allocation2_spill] sm:$0xff] }
 0x156   :  { %v2877_v37 = vpop.f32.mrf.mxu1  ;;  %v2904_v52 = vadd.f32 %v2016_v35, %v2969_v38  ;;  %v2037_v2 = vadd.f32 %v2036_v36, %v2035_v32  ;;  %v1415_v15 = vadd.f32 %v2098_v63, %v1318_v57 }
 0x157   :  { %2967 = vst [vmem:[#allocation15_spill] sm:$0xff] %v2877_v37  ;;  %v2038_v31 = vpop.f32.mrf.mxu0  ;;  %v1286_v37 = vadd.f32 %v2010_v21, %v2818_v51  ;;  %v1375_v51 = vadd.f32 %v2068_v44, %v1278_v56  ;;  %v1380_v7 = vadd.f32 %v2071_v18, %v1283_v33  ;;  %v2970_v56 = vld [vmem:[#allocation4_spill] sm:$0xff]  ;;  %v1396_v16 = vadd.f32 %v2083_v45, %v1299_v43 }
 0x158   :  { %v2879_v1 = vpop.f32.mrf.mxu1  ;;  %v1310_v47 = vadd.f32 %v2028_v10, %v2970_v56  ;;  %v2975_v33 = vld [vmem:[#allocation12_spill] sm:$0xff] }
 0x159   :  { %2968 = vst [vmem:[#allocation16_spill] sm:$0xff] %v2879_v1  ;;  %v2039_v5 = vpop.f32.mrf.mxu0  ;;  %v1383_v19 = vadd.f32 %v2074_v48, %v1286_v37  ;;  %v2086_v37 = vadd.f32 %v2975_v33, %v2974_v28  ;;  %v2980_v48 = vld [vmem:[#allocation6_spill] sm:$0xff] }
 0x15a   :  { %v2881_v20 = vpop.f32.mrf.mxu1  ;;  %v2040_v4 = vadd.f32 %v2039_v5, %v2038_v31  ;;  %v2979_v5 = vld [vmem:[#allocation10_spill] sm:$0xff]  ;;  %v1323_v50 = vadd.f32 %v2037_v2, %v2980_v48 }
 0x15b   :  { %v2041_v9 = vpop.f32.mrf.mxu0 }
 0x15c   :  { %v2884_v3 = vpop.f32.mrf.mxu1  ;;  %v1326_v35 = vadd.f32 %v2040_v4, %v2981_v55  ;;  %v1399_v4 = vadd.f32 %v2086_v37, %v1302_v25  ;;  %v1391_v25 = vadd.f32 %v2899_v41, %v2904_v52 }
 0x15d   :  { %v2042_v1 = vpop.f32.mrf.mxu0 }
 0x15e   :  { %v2106_v53 = vpop.f32.mrf.mxu1  ;;  %v2043_v58 = vadd.f32 %v2042_v1, %v2041_v9  ;;  %v1407_v1 = vadd.f32 %v2092_v14, %v1310_v47  ;;  %v2976_v9 = vld [vmem:[#allocation14_spill] sm:$0xff]  ;;  %v2977_v17 = vld [vmem:[#allocation15_spill] sm:$0xff] }
 0x15f   :  { %v2044_v0 = vpop.f32.mrf.mxu0  ;;  %v2101_v26 = vadd.f32 %v2977_v17, %v2976_v9  ;;  %v2107_v43 = vadd.f32 %v2106_v53, %v2884_v3 }
 0x160   :  { %v2892_v42 = vpop.f32.mrf.mxu1  ;;  %v1331_v31 = vadd.f32 %v2043_v58, %v2978_v30 }
 0x161   :  { %v2045_v21 = vpop.f32.mrf.mxu0  ;;  %v1420_v63 = vadd.f32 %v2101_v26, %v1323_v50 }
 0x162   :  { %v2109_v11 = vpop.f32.mrf.mxu1  ;;  %v2046_v40 = vadd.f32 %v2045_v21, %v2044_v0 }
 0x163   :  { %v2145_v60 = vpop.f32.mrf.mxu0  ;;  %v2110_v12 = vadd.f32 %v2109_v11, %v2892_v42 }
 0x164   :  { %v2153_v61 = vpop.f32.mrf.mxu1  ;;  %v1477_v22 = vadd.f32 %v2145_v60, %v1380_v7  ;;  %v1334_v49 = vadd.f32 %v2046_v40, %v2982_v46  ;;  %v1428_v60 = vadd.f32 %v2107_v43, %v1331_v31 }
 0x165   :  { %v1468_v6 = vpop.f32.mrf.mxu0  ;;  %v1509_v44 = vadd.f32 %v2153_v61, %v1412_v29  ;;  %v2983_v29 = vld [vmem:[#allocation16_spill] sm:$0xff] }
 0x166   :  { %v1500_v34 = vpop.f32.mrf.mxu1  ;;  %v1469_v32 = vadd.f32 %v1468_v6, %v2979_v5  ;;  %v1533_v59 = vmax.f32 %v1477_v22, 0.0  ;;  %v2104_v6 = vadd.f32 %v2881_v20, %v2983_v29  ;;  %v1431_v28 = vadd.f32 %v2110_v12, %v1334_v49 }
 0x167   :  { %v2146_v13 = vpop.f32.mrf.mxu0  ;;  %v1501_v10 = vadd.f32 %v1500_v34, %v1404_v24  ;;  %v1541_v38 = vmax.f32 %v1509_v44, 0.0 }
 0x168   :  { %v1480_v36 = vadd.f32 %v2146_v13, %v1383_v19  ;;  %v2154_v18 = vpop.f32.mrf.mxu1  ;;  %v1531_v54 = vmax.f32 %v1469_v32, 0.0  ;;  %v1423_v34 = vadd.f32 %v2104_v6, %v1326_v35 }
 0x169   :  { %v1512_v62 = vadd.f32 %v2154_v18, %v1415_v15  ;;  %v1471_v0 = vpop.f32.mrf.mxu0  ;;  %v1539_v14 = vmax.f32 %v1501_v10, 0.0 }
 0x16a   :  { %v1534_v21 = vmax.f32 %v1480_v36, 0.0  ;;  %v1472_v7 = vadd.f32 %v1471_v0, %v1375_v51  ;;  %v1503_v45 = vpop.f32.mrf.mxu1 }
 0x16b   :  { %v1542_v56 = vmax.f32 %v1512_v62, 0.0  ;;  %v1504_v47 = vadd.f32 %v1503_v45, %v1407_v1  ;;  %v2149_v19 = vpop.f32.mrf.mxu0 }
 0x16c   :  { %v1816_v27 = vpack.c.bf16 %v1534_v21, %v1533_v59  ;;  %v1532_v57 = vmax.f32 %v1472_v7, 0.0  ;;  %v2157_v8 = vpop.f32.mrf.mxu1  ;;  %v1493_v61 = vadd.f32 %v2149_v19, %v1396_v16 }
 0x16d   :  { %v1836_v58 = vpack.c.bf16 %v1542_v56, %v1541_v38  ;;  %v1540_v3 = vmax.f32 %v1504_v47, 0.0  ;;  %v1484_v53 = vpop.f32.mrf.mxu0  ;;  %v1525_v11 = vadd.f32 %v2157_v8, %v1428_v60 }
 0x16e   :  { %1848 = vst [vmem:[%s2953_s3 + $0x8] sm:$0xff] %v1816_v27   ;;  %v1811_v51 = vpack.c.bf16 %v1532_v57, %v1531_v54  ;;  %v1516_v2 = vpop.f32.mrf.mxu1  ;;  %v1485_v16 = vadd.f32 %v1484_v53, %v2895_v39  ;;  %v1537_v40 = vmax.f32 %v1493_v61, 0.0 }
 0x16f   :  { %1852 = vst [vmem:[%s2953_s3 + $0x28] sm:$0xff] %v1836_v58   ;;  %v1831_v42 = vpack.c.bf16 %v1540_v3, %v1539_v14  ;;  %v2150_v23 = vpop.f32.mrf.mxu0  ;;  %v1517_v20 = vadd.f32 %v1516_v2, %v1420_v63  ;;  %v1545_v1 = vmax.f32 %v1525_v11, 0.0 }
 0x170   :  { %1812 = vst [vmem:[%s2953_s3] sm:$0xff] %v1811_v51   ;;  %v1496_v33 = vadd.f32 %v2150_v23, %v1399_v4  ;;  %v2158_v22 = vpop.f32.mrf.mxu1  ;;  %v1535_v17 = vmax.f32 %v1485_v16, 0.0 }
 0x171   :  { %1851 = vst [vmem:[%s2953_s3 + $0x20] sm:$0xff] %v1831_v42   ;;  %v1528_v37 = vadd.f32 %v2158_v22, %v1431_v28  ;;  %v1487_v24 = vpop.f32.mrf.mxu0  ;;  %v1543_v31 = vmax.f32 %v1517_v20, 0.0 }
 0x172   :  { %v1538_v44 = vmax.f32 %v1496_v33, 0.0  ;;  %v1488_v13 = vadd.f32 %v1487_v24, %v1391_v25  ;;  %v1519_v15 = vpop.f32.mrf.mxu1 }
 0x173   :  { %v1546_v9 = vmax.f32 %v1528_v37, 0.0  ;;  %v1520_v39 = vadd.f32 %v1519_v15, %v1423_v34 }
 0x174   :  { %v1826_v26 = vpack.c.bf16 %v1538_v44, %v1537_v40  ;;  %v1536_v30 = vmax.f32 %v1488_v13, 0.0 }
 0x175   :  { %v1846_v41 = vpack.c.bf16 %v1546_v9, %v1545_v1  ;;  %v1544_v52 = vmax.f32 %v1520_v39, 0.0 }
 0x176   :  { %1850 = vst [vmem:[%s2953_s3 + $0x18] sm:$0xff] %v1826_v26   ;;  %v1821_v5 = vpack.c.bf16 %v1536_v30, %v1535_v17 }
 0x177   :  { %1854 = vst [vmem:[%s2953_s3 + $0x38] sm:$0xff] %v1846_v41   ;;  %v1841_v32 = vpack.c.bf16 %v1544_v52, %v1543_v31 }
 0x178   :  { %1849 = vst [vmem:[%s2953_s3 + $0x10] sm:$0xff] %v1821_v5  }
 0x179   :  { %1853 = vst [vmem:[%s2953_s3 + $0x30] sm:$0xff] %v1841_v32  }

</bundles_post_ra>
